<compile_context>
chip_gen: v6e
topology: v6e:2x2x1
jax: 0.10.0
libtpu: 0.0.40
codegen_flags: <defaults>
</compile_context>

<pallas_src>
import jax
import jax.numpy as jnp
import numpy as np
from jax import lax
from jax.experimental import pallas as pl
from jax.experimental.pallas import tpu as pltpu


def _round_up(x, m):
    return ((x + m - 1) // m) * m


def _make_warp_kernel(H, W, C, TS):
    P = H * W
    NS = P // TS
    EXT = _round_up(W + 1, 8)      # pad rows below each strip (>= W+1, sublane aligned)
    TS_EXT = TS + EXT
    Wf, Hf = float(W), float(H)

    def kernel(disp_ref, left_ref, right_ref, warp_ref, loss_ref):
        # x-coordinate of every destination pixel (the module's `grid`), built in-kernel.
        xg = (lax.broadcasted_iota(jnp.int32, (1, P), 1) % W).astype(jnp.float32)

        dx = disp_ref[0, 0:1, :]                    # (1, P)
        dy = disp_ref[0, 1:2, :]                    # (1, P)
        vx = xg - dx                                # vgrid = grid - disp (x channel)
        vy = xg - dy                                # (y channel uses the same x-grid)

        # grid_sample unnormalization (bilinear, zeros padding, align_corners=False)
        ix = ((vx + 1.0) * Wf - 1.0) * 0.5
        iy = ((vy + 1.0) * Hf - 1.0) * 0.5

        x0f = jnp.floor(ix)
        y0f = jnp.floor(iy)
        wx1 = ix - x0f
        wx0 = 1.0 - wx1
        wy1 = iy - y0f
        wy0 = 1.0 - wy1

        x0 = x0f.astype(jnp.int32)
        y0 = y0f.astype(jnp.int32)
        x1 = x0 + 1
        y1 = y0 + 1

        def inb(y, x):
            return ((x >= 0) & (x < W) & (y >= 0) & (y < H)).astype(jnp.float32)

        # Corner weights with the in-bounds (zeros-padding) factor folded in — this is
        # what keeps aliased out-of-bounds flat indices harmless.
        w00 = wy0 * wx0 * inb(y0, x0)
        w01 = wy0 * wx1 * inb(y0, x1)
        w10 = wy1 * wx0 * inb(y1, x0)
        w11 = wy1 * wx1 * inb(y1, x1)

        # grid_sample of an all-ones image == sum of in-bounds corner weights.
        maskv = w00 + w01 + w10 + w11
        m = (maskv >= 0.999).astype(jnp.float32)    # binarized mask, (1, P)

        # int32 flat source index of the top-left corner (exact for any realistic P).
        q00 = y0 * W + x0                           # (1, P)
        # Row r of strip k's extended mask corresponds to source (k*TS + r - (W+1)),
        # so corner offsets {0, 1, W, W+1} become static sublane shifts of one mask.
        tgt0 = q00 + (W + 1)

        rows = lax.broadcasted_iota(jnp.int32, (TS_EXT, P), 0)   # hoisted, loop-invariant

        def strip(k, acc):
            tgt = tgt0 - k * TS                                    # (1, P) int32
            eq = (rows == tgt).astype(jnp.float32)                 # (TS_EXT, P), 1 compare
            # Derive the 4 corner masks from the single eq via XLU rolls + leading slice.
            slab = w11 * eq[:TS, :]
            slab = slab + w10 * pltpu.roll(eq, TS_EXT - 1, 0)[:TS, :]
            slab = slab + w01 * pltpu.roll(eq, TS_EXT - W, 0)[:TS, :]
            slab = slab + w00 * pltpu.roll(eq, TS_EXT - (W + 1), 0)[:TS, :]
            rs = right_ref[0, k, :, :]                             # (C, TS)
            return acc + jnp.dot(rs, slab, preferred_element_type=jnp.float32)

        acc = lax.fori_loop(0, NS, strip, jnp.zeros((C, P), jnp.float32), unroll=True)

        warp = acc * m
        left_m = left_ref[0] * m
        warp_ref[0] = warp.astype(warp_ref.dtype)
        # Per-batch partial |.|-sum (no cross-grid-step accumulator -> batch is parallel).
        loss_ref[...] = jnp.broadcast_to(jnp.sum(jnp.abs(warp - left_m)), (1, 1, 1))

    return kernel


def img_warp_loss(disp, left_img, right_img):
    """Pallas implementation of Img_warp_loss.forward. Returns (loss, img_warp_mask)."""
    B, Cd, H, W = disp.shape
    assert Cd == 2, "grid_sample needs a 2-channel grid -> disp must have 2 channels"
    C = left_img.shape[1]
    P = H * W

    # Source-strip size: large enough to feed the MXU, small enough that the extended
    # equality mask + one rolled copy + the slab stay within the 64-entry vreg file.
    TS = 64 if P % 64 == 0 else P
    assert P % TS == 0 and TS % 8 == 0
    NS = P // TS

    disp_f = disp.reshape(B, 2, P).astype(jnp.float32)
    left_f = left_img.reshape(B, C, P).astype(jnp.float32)
    # Pre-strip the right image: strip selection inside the kernel is then a dynamic
    # index on an untiled leading axis (no dynamic lane-dim slicing).
    right_s = right_img.astype(jnp.float32).reshape(B, C, NS, TS).transpose(0, 2, 1, 3)

    warp_f, loss_parts = pl.pallas_call(
        _make_warp_kernel(H, W, C, TS),
        out_shape=(jax.ShapeDtypeStruct((B, C, P), jnp.float32),
                   jax.ShapeDtypeStruct((B, 1, 1), jnp.float32)),
        grid_spec=pltpu.PrefetchScalarGridSpec(
            num_scalar_prefetch=0,
            grid=(B,),
            in_specs=[
                pl.BlockSpec((1, 2, P), lambda b: (b, 0, 0)),          # disp
                pl.BlockSpec((1, C, P), lambda b: (b, 0, 0)),          # left
                pl.BlockSpec((1, NS, C, TS), lambda b: (b, 0, 0, 0)),  # right (stripped)
            ],
            out_specs=(
                pl.BlockSpec((1, C, P), lambda b: (b, 0, 0)),          # warped image
                pl.BlockSpec((1, 1, 1), lambda b: (b, 0, 0)),          # per-batch |.|-sum
            ),
        ),
        # Per-batch partials -> batch axis can be "parallel": sharded across the two
        # TensorCores on v7x, neutral on single-TC v5e/v6e. (On v5e/v6e the B grid
        # steps could also be folded into one kernel invocation to save ~0.35us/step.)
        compiler_params=pltpu.CompilerParams(dimension_semantics=("parallel",)),
    )(disp_f, left_f, right_s)

    loss = jnp.sum(loss_parts) / (B * C * H * W)     # L1Loss(reduction='mean')
    warp = warp_f.reshape(B, C, H, W)
    return loss, warp


def img_warp_loss_ref(disp, left, right):
    """Pure-JAX reference (gather-based grid_sample) for validation."""
    B, _, H, W = disp.shape
    C = left.shape[1]
    xg = jnp.arange(W, dtype=jnp.float32)[None, None, None, :]
    vx = xg - disp[:, 0:1]
    vy = xg - disp[:, 1:2]
    ix = ((vx + 1.0) * W - 1.0) * 0.5
    iy = ((vy + 1.0) * H - 1.0) * 0.5
    x0 = jnp.floor(ix); x1 = x0 + 1.0
    y0 = jnp.floor(iy); y1 = y0 + 1.0
    wx1 = ix - x0; wx0 = 1.0 - wx1
    wy1 = iy - y0; wy0 = 1.0 - wy1

    def inb(y, x):
        return ((x >= 0.0) & (x <= W - 1.0) & (y >= 0.0) & (y <= H - 1.0)).astype(jnp.float32)

    def gather(img, y, x):
        yc = jnp.clip(y, 0, H - 1).astype(jnp.int32)
        xc = jnp.clip(x, 0, W - 1).astype(jnp.int32)
        flat = img.reshape(B, C, H * W)
        idx = (yc * W + xc).reshape(B, 1, H * W)
        g = jnp.take_along_axis(flat, jnp.broadcast_to(idx, (B, C, H * W)), axis=2)
        return g.reshape(B, C, H, W)

    w00 = wy0 * wx0 * inb(y0, x0)
    w01 = wy0 * wx1 * inb(y0, x1)
    w10 = wy1 * wx0 * inb(y1, x0)
    w11 = wy1 * wx1 * inb(y1, x1)
    out = (w00 * gather(right, y0, x0) + w01 * gather(right, y0, x1)
           + w10 * gather(right, y1, x0) + w11 * gather(right, y1, x1))
    maskv = w00 + w01 + w10 + w11
    m = (maskv >= 0.999).astype(jnp.float32)
    warp = out * m
    loss = jnp.mean(jnp.abs(warp - left * m))
    return loss, warp


if __name__ == "__main__":
    B, C, H, W = 2, 3, 16, 16
    key = jax.random.PRNGKey(0)
    k1, k2, k3 = jax.random.split(key, 3)
    disp = jax.random.uniform(k1, (B, 2, H, W), jnp.float32, minval=-2.0, maxval=W + 2.0)
    left = jax.random.normal(k2, (B, C, H, W), jnp.float32)
    right = jax.random.normal(k3, (B, C, H, W), jnp.float32)

    loss, warp = img_warp_loss(disp, left, right)
    jax.block_until_ready((loss, warp))

    loss_r, warp_r = img_warp_loss_ref(disp, left, right)
    np.testing.assert_allclose(np.asarray(warp), np.asarray(warp_r), atol=5e-2, rtol=0)
    np.testing.assert_allclose(np.asarray(loss), np.asarray(loss_r), atol=5e-2, rtol=0)
    print("KERNEL_OK")
</pallas_src>

<mosaic_0001>
module attributes {stable_mosaic.version = 11 : i64} {
  func.func @kernel(%arg0: i32, %arg1: memref<1x2x256xf32, #tpu.memory_space<vmem>>, %arg2: memref<1x3x256xf32, #tpu.memory_space<vmem>>, %arg3: memref<1x4x3x64xf32, #tpu.memory_space<vmem>>, %arg4: memref<1x3x256xf32, #tpu.memory_space<vmem>>, %arg5: memref<1x1x1xf32, #tpu.memory_space<vmem>>) attributes {dimension_semantics = [#tpu.dimension_semantics<parallel>], iteration_bounds = array<i64: 2>, scalar_prefetch = 0 : i64, scratch_operands = 0 : i64, tpu.core_type = #tpu.core_type<tc>, window_params = [{transform_indices = @transform_0, window_bounds = array<i64: 1, 2, 256>}, {transform_indices = @transform_1, window_bounds = array<i64: 1, 3, 256>}, {transform_indices = @transform_2, window_bounds = array<i64: 1, 4, 3, 64>}, {transform_indices = @transform_3, window_bounds = array<i64: 1, 3, 256>}, {transform_indices = @transform_4, window_bounds = array<i64: 1, 1, 1>}]} {
    %0 = tpu.iota {dimensions = array<i32: 1>} : vector<1x256xi32>
    %c16_i32 = arith.constant 16 : i32
    %c0_i32 = arith.constant 0 : i32
    %1 = arith.cmpi eq, %c16_i32, %c0_i32 : i32
    %c1_i32 = arith.constant 1 : i32
    %2 = arith.select %1, %c1_i32, %c16_i32 : i32
    %3 = vector.broadcast %2 : i32 to vector<1x256xi32>
    %4 = arith.remsi %0, %3 : vector<1x256xi32>
    %c0_i32_0 = arith.constant 0 : i32
    %5 = vector.broadcast %c0_i32_0 : i32 to vector<1x256xi32>
    %6 = arith.cmpi ne, %4, %5 : vector<1x256xi32>
    %c0_i32_1 = arith.constant 0 : i32
    %7 = vector.broadcast %c0_i32_1 : i32 to vector<1x256xi32>
    %8 = arith.cmpi slt, %4, %7 : vector<1x256xi32>
    %c0_i32_2 = arith.constant 0 : i32
    %9 = arith.cmpi slt, %2, %c0_i32_2 : i32
    %10 = vector.broadcast %9 : i1 to vector<1x256xi1>
    %11 = vector.broadcast %10 : vector<1x256xi1> to vector<1x256xi1>
    %12 = arith.xori %8, %11 : vector<1x256xi1>
    %13 = arith.andi %12, %6 : vector<1x256xi1>
    %14 = vector.broadcast %2 : i32 to vector<1x256xi32>
    %15 = arith.addi %4, %14 : vector<1x256xi32>
    %16 = arith.select %13, %15, %4 : vector<1x256xi1>, vector<1x256xi32>
    %17 = arith.sitofp %16 : vector<1x256xi32> to vector<1x256xf32>
    %c0 = arith.constant 0 : index
    %c0_3 = arith.constant 0 : index
    %c0_4 = arith.constant 0 : index
    %18 = vector.load %arg1[%c0, %c0_3, %c0_4] : memref<1x2x256xf32, #tpu.memory_space<vmem>>, vector<1x1x256xf32>
    %19 = vector.shape_cast %18 : vector<1x1x256xf32> to vector<1x256xf32>
    %c0_5 = arith.constant 0 : index
    %c1 = arith.constant 1 : index
    %c0_6 = arith.constant 0 : index
    %20 = vector.load %arg1[%c0_5, %c1, %c0_6] : memref<1x2x256xf32, #tpu.memory_space<vmem>>, vector<1x1x256xf32>
    %21 = vector.shape_cast %20 : vector<1x1x256xf32> to vector<1x256xf32>
    %22 = arith.subf %17, %19 : vector<1x256xf32>
    %23 = arith.subf %17, %21 : vector<1x256xf32>
    %cst = arith.constant 1.000000e+00 : f32
    %24 = vector.broadcast %cst : f32 to vector<1x256xf32>
    %25 = arith.addf %22, %24 : vector<1x256xf32>
    %cst_7 = arith.constant 1.600000e+01 : f32
    %26 = vector.broadcast %cst_7 : f32 to vector<1x256xf32>
    %27 = arith.mulf %25, %26 : vector<1x256xf32>
    %cst_8 = arith.constant 1.000000e+00 : f32
    %28 = vector.broadcast %cst_8 : f32 to vector<1x256xf32>
    %29 = arith.subf %27, %28 : vector<1x256xf32>
    %cst_9 = arith.constant 5.000000e-01 : f32
    %30 = vector.broadcast %cst_9 : f32 to vector<1x256xf32>
    %31 = arith.mulf %29, %30 : vector<1x256xf32>
    %cst_10 = arith.constant 1.000000e+00 : f32
    %32 = vector.broadcast %cst_10 : f32 to vector<1x256xf32>
    %33 = arith.addf %23, %32 : vector<1x256xf32>
    %cst_11 = arith.constant 1.600000e+01 : f32
    %34 = vector.broadcast %cst_11 : f32 to vector<1x256xf32>
    %35 = arith.mulf %33, %34 : vector<1x256xf32>
    %cst_12 = arith.constant 1.000000e+00 : f32
    %36 = vector.broadcast %cst_12 : f32 to vector<1x256xf32>
    %37 = arith.subf %35, %36 : vector<1x256xf32>
    %cst_13 = arith.constant 5.000000e-01 : f32
    %38 = vector.broadcast %cst_13 : f32 to vector<1x256xf32>
    %39 = arith.mulf %37, %38 : vector<1x256xf32>
    %40 = math.floor %31 : vector<1x256xf32>
    %41 = math.floor %39 : vector<1x256xf32>
    %42 = arith.subf %31, %40 : vector<1x256xf32>
    %cst_14 = arith.constant 1.000000e+00 : f32
    %43 = vector.broadcast %cst_14 : f32 to vector<1x256xf32>
    %44 = arith.subf %43, %42 : vector<1x256xf32>
    %45 = arith.subf %39, %41 : vector<1x256xf32>
    %cst_15 = arith.constant 1.000000e+00 : f32
    %46 = vector.broadcast %cst_15 : f32 to vector<1x256xf32>
    %47 = arith.subf %46, %45 : vector<1x256xf32>
    %48 = arith.fptosi %40 : vector<1x256xf32> to vector<1x256xi32>
    %49 = arith.fptosi %41 : vector<1x256xf32> to vector<1x256xi32>
    %c1_i32_16 = arith.constant 1 : i32
    %50 = vector.broadcast %c1_i32_16 : i32 to vector<1x256xi32>
    %51 = arith.addi %48, %50 : vector<1x256xi32>
    %c1_i32_17 = arith.constant 1 : i32
    %52 = vector.broadcast %c1_i32_17 : i32 to vector<1x256xi32>
    %53 = arith.addi %49, %52 : vector<1x256xi32>
    %54 = arith.mulf %47, %44 : vector<1x256xf32>
    %c0_i32_18 = arith.constant 0 : i32
    %55 = vector.broadcast %c0_i32_18 : i32 to vector<1x256xi32>
    %56 = arith.cmpi sge, %48, %55 : vector<1x256xi32>
    %c16_i32_19 = arith.constant 16 : i32
    %57 = vector.broadcast %c16_i32_19 : i32 to vector<1x256xi32>
    %58 = arith.cmpi slt, %48, %57 : vector<1x256xi32>
    %59 = arith.andi %56, %58 : vector<1x256xi1>
    %c0_i32_20 = arith.constant 0 : i32
    %60 = vector.broadcast %c0_i32_20 : i32 to vector<1x256xi32>
    %61 = arith.cmpi sge, %49, %60 : vector<1x256xi32>
    %62 = arith.andi %59, %61 : vector<1x256xi1>
    %c16_i32_21 = arith.constant 16 : i32
    %63 = vector.broadcast %c16_i32_21 : i32 to vector<1x256xi32>
    %64 = arith.cmpi slt, %49, %63 : vector<1x256xi32>
    %65 = arith.andi %62, %64 : vector<1x256xi1>
    %66 = arith.extui %65 : vector<1x256xi1> to vector<1x256xi32>
    %67 = arith.sitofp %66 : vector<1x256xi32> to vector<1x256xf32>
    %68 = arith.mulf %54, %67 : vector<1x256xf32>
    %69 = arith.mulf %47, %42 : vector<1x256xf32>
    %c0_i32_22 = arith.constant 0 : i32
    %70 = vector.broadcast %c0_i32_22 : i32 to vector<1x256xi32>
    %71 = arith.cmpi sge, %51, %70 : vector<1x256xi32>
    %c16_i32_23 = arith.constant 16 : i32
    %72 = vector.broadcast %c16_i32_23 : i32 to vector<1x256xi32>
    %73 = arith.cmpi slt, %51, %72 : vector<1x256xi32>
    %74 = arith.andi %71, %73 : vector<1x256xi1>
    %c0_i32_24 = arith.constant 0 : i32
    %75 = vector.broadcast %c0_i32_24 : i32 to vector<1x256xi32>
    %76 = arith.cmpi sge, %49, %75 : vector<1x256xi32>
    %77 = arith.andi %74, %76 : vector<1x256xi1>
    %c16_i32_25 = arith.constant 16 : i32
    %78 = vector.broadcast %c16_i32_25 : i32 to vector<1x256xi32>
    %79 = arith.cmpi slt, %49, %78 : vector<1x256xi32>
    %80 = arith.andi %77, %79 : vector<1x256xi1>
    %81 = arith.extui %80 : vector<1x256xi1> to vector<1x256xi32>
    %82 = arith.sitofp %81 : vector<1x256xi32> to vector<1x256xf32>
    %83 = arith.mulf %69, %82 : vector<1x256xf32>
    %84 = arith.mulf %45, %44 : vector<1x256xf32>
    %c0_i32_26 = arith.constant 0 : i32
    %85 = vector.broadcast %c0_i32_26 : i32 to vector<1x256xi32>
    %86 = arith.cmpi sge, %48, %85 : vector<1x256xi32>
    %c16_i32_27 = arith.constant 16 : i32
    %87 = vector.broadcast %c16_i32_27 : i32 to vector<1x256xi32>
    %88 = arith.cmpi slt, %48, %87 : vector<1x256xi32>
    %89 = arith.andi %86, %88 : vector<1x256xi1>
    %c0_i32_28 = arith.constant 0 : i32
    %90 = vector.broadcast %c0_i32_28 : i32 to vector<1x256xi32>
    %91 = arith.cmpi sge, %53, %90 : vector<1x256xi32>
    %92 = arith.andi %89, %91 : vector<1x256xi1>
    %c16_i32_29 = arith.constant 16 : i32
    %93 = vector.broadcast %c16_i32_29 : i32 to vector<1x256xi32>
    %94 = arith.cmpi slt, %53, %93 : vector<1x256xi32>
    %95 = arith.andi %92, %94 : vector<1x256xi1>
    %96 = arith.extui %95 : vector<1x256xi1> to vector<1x256xi32>
    %97 = arith.sitofp %96 : vector<1x256xi32> to vector<1x256xf32>
    %98 = arith.mulf %84, %97 : vector<1x256xf32>
    %99 = arith.mulf %45, %42 : vector<1x256xf32>
    %c0_i32_30 = arith.constant 0 : i32
    %100 = vector.broadcast %c0_i32_30 : i32 to vector<1x256xi32>
    %101 = arith.cmpi sge, %51, %100 : vector<1x256xi32>
    %c16_i32_31 = arith.constant 16 : i32
    %102 = vector.broadcast %c16_i32_31 : i32 to vector<1x256xi32>
    %103 = arith.cmpi slt, %51, %102 : vector<1x256xi32>
    %104 = arith.andi %101, %103 : vector<1x256xi1>
    %c0_i32_32 = arith.constant 0 : i32
    %105 = vector.broadcast %c0_i32_32 : i32 to vector<1x256xi32>
    %106 = arith.cmpi sge, %53, %105 : vector<1x256xi32>
    %107 = arith.andi %104, %106 : vector<1x256xi1>
    %c16_i32_33 = arith.constant 16 : i32
    %108 = vector.broadcast %c16_i32_33 : i32 to vector<1x256xi32>
    %109 = arith.cmpi slt, %53, %108 : vector<1x256xi32>
    %110 = arith.andi %107, %109 : vector<1x256xi1>
    %111 = arith.extui %110 : vector<1x256xi1> to vector<1x256xi32>
    %112 = arith.sitofp %111 : vector<1x256xi32> to vector<1x256xf32>
    %113 = arith.mulf %99, %112 : vector<1x256xf32>
    %114 = arith.addf %68, %83 : vector<1x256xf32>
    %115 = arith.addf %114, %98 : vector<1x256xf32>
    %116 = arith.addf %115, %113 : vector<1x256xf32>
    %cst_34 = arith.constant 9.990000e-01 : f32
    %117 = vector.broadcast %cst_34 : f32 to vector<1x256xf32>
    %118 = arith.cmpf oge, %116, %117 : vector<1x256xf32>
    %119 = arith.extui %118 : vector<1x256xi1> to vector<1x256xi32>
    %120 = arith.sitofp %119 : vector<1x256xi32> to vector<1x256xf32>
    %c16_i32_35 = arith.constant 16 : i32
    %121 = vector.broadcast %c16_i32_35 : i32 to vector<1x256xi32>
    %122 = arith.muli %49, %121 : vector<1x256xi32>
    %123 = arith.addi %122, %48 : vector<1x256xi32>
    %c17_i32 = arith.constant 17 : i32
    %124 = vector.broadcast %c17_i32 : i32 to vector<1x256xi32>
    %125 = arith.addi %123, %124 : vector<1x256xi32>
    %126 = tpu.iota {dimensions = array<i32: 0>} : vector<88x256xi32>
    %cst_36 = arith.constant 0.000000e+00 : f32
    %127 = vector.broadcast %cst_36 : f32 to vector<3x256xf32>
    %c0_i32_37 = arith.constant 0 : i32
    %c64_i32 = arith.constant 64 : i32
    %128 = arith.muli %c0_i32_37, %c64_i32 : i32
    %129 = vector.broadcast %128 : i32 to vector<1x256xi32>
    %130 = arith.subi %125, %129 : vector<1x256xi32>
    %131 = vector.broadcast %130 : vector<1x256xi32> to vector<88x256xi32>
    %132 = arith.cmpi eq, %126, %131 : vector<88x256xi32>
    %133 = arith.extui %132 : vector<88x256xi1> to vector<88x256xi32>
    %134 = arith.sitofp %133 : vector<88x256xi32> to vector<88x256xf32>
    %135 = vector.extract_strided_slice %134 {offsets = [0, 0], sizes = [64, 256], strides = [1, 1]} : vector<88x256xf32> to vector<64x256xf32>
    %136 = vector.broadcast %113 : vector<1x256xf32> to vector<64x256xf32>
    %137 = arith.mulf %136, %135 : vector<64x256xf32>
    %c87_i32 = arith.constant 87 : i32
    %138 = tpu.dynamic_rotate %134 by %c87_i32 dim 0 : vector<88x256xf32>, i32 -> vector<88x256xf32>
    %139 = vector.extract_strided_slice %138 {offsets = [0, 0], sizes = [64, 256], strides = [1, 1]} : vector<88x256xf32> to vector<64x256xf32>
    %140 = vector.broadcast %98 : vector<1x256xf32> to vector<64x256xf32>
    %141 = arith.mulf %140, %139 : vector<64x256xf32>
    %142 = arith.addf %137, %141 : vector<64x256xf32>
    %c72_i32 = arith.constant 72 : i32
    %143 = tpu.dynamic_rotate %134 by %c72_i32 dim 0 : vector<88x256xf32>, i32 -> vector<88x256xf32>
    %144 = vector.extract_strided_slice %143 {offsets = [0, 0], sizes = [64, 256], strides = [1, 1]} : vector<88x256xf32> to vector<64x256xf32>
    %145 = vector.broadcast %83 : vector<1x256xf32> to vector<64x256xf32>
    %146 = arith.mulf %145, %144 : vector<64x256xf32>
    %147 = arith.addf %142, %146 : vector<64x256xf32>
    %c71_i32 = arith.constant 71 : i32
    %148 = tpu.dynamic_rotate %134 by %c71_i32 dim 0 : vector<88x256xf32>, i32 -> vector<88x256xf32>
    %149 = vector.extract_strided_slice %148 {offsets = [0, 0], sizes = [64, 256], strides = [1, 1]} : vector<88x256xf32> to vector<64x256xf32>
    %150 = vector.broadcast %68 : vector<1x256xf32> to vector<64x256xf32>
    %151 = arith.mulf %150, %149 : vector<64x256xf32>
    %152 = arith.addf %147, %151 : vector<64x256xf32>
    %c0_38 = arith.constant 0 : index
    %153 = arith.index_cast %c0_i32_37 : i32 to index
    %c0_39 = arith.constant 0 : index
    %c0_40 = arith.constant 0 : index
    %154 = vector.load %arg3[%c0_38, %153, %c0_39, %c0_40] : memref<1x4x3x64xf32, #tpu.memory_space<vmem>>, vector<1x1x3x64xf32>
    %155 = vector.shape_cast %154 : vector<1x1x3x64xf32> to vector<3x64xf32>
    %cst_41 = arith.constant dense<0.000000e+00> : vector<3x256xf32>
    %156 = tpu.matmul %155, %152, %cst_41 {dimension_numbers = #tpu.dot_dimension_numbers<[1], [0], [0], [1], [0, 0, 1, 1], [], []>} : vector<3x64xf32>, vector<64x256xf32>, vector<3x256xf32> -> vector<3x256xf32>
    %157 = arith.addf %127, %156 : vector<3x256xf32>
    %c1_i32_42 = arith.constant 1 : i32
    %c64_i32_43 = arith.constant 64 : i32
    %158 = arith.muli %c1_i32_42, %c64_i32_43 : i32
    %159 = vector.broadcast %158 : i32 to vector<1x256xi32>
    %160 = arith.subi %125, %159 : vector<1x256xi32>
    %161 = vector.broadcast %160 : vector<1x256xi32> to vector<88x256xi32>
    %162 = arith.cmpi eq, %126, %161 : vector<88x256xi32>
    %163 = arith.extui %162 : vector<88x256xi1> to vector<88x256xi32>
    %164 = arith.sitofp %163 : vector<88x256xi32> to vector<88x256xf32>
    %165 = vector.extract_strided_slice %164 {offsets = [0, 0], sizes = [64, 256], strides = [1, 1]} : vector<88x256xf32> to vector<64x256xf32>
    %166 = vector.broadcast %113 : vector<1x256xf32> to vector<64x256xf32>
    %167 = arith.mulf %166, %165 : vector<64x256xf32>
    %c87_i32_44 = arith.constant 87 : i32
    %168 = tpu.dynamic_rotate %164 by %c87_i32_44 dim 0 : vector<88x256xf32>, i32 -> vector<88x256xf32>
    %169 = vector.extract_strided_slice %168 {offsets = [0, 0], sizes = [64, 256], strides = [1, 1]} : vector<88x256xf32> to vector<64x256xf32>
    %170 = vector.broadcast %98 : vector<1x256xf32> to vector<64x256xf32>
    %171 = arith.mulf %170, %169 : vector<64x256xf32>
    %172 = arith.addf %167, %171 : vector<64x256xf32>
    %c72_i32_45 = arith.constant 72 : i32
    %173 = tpu.dynamic_rotate %164 by %c72_i32_45 dim 0 : vector<88x256xf32>, i32 -> vector<88x256xf32>
    %174 = vector.extract_strided_slice %173 {offsets = [0, 0], sizes = [64, 256], strides = [1, 1]} : vector<88x256xf32> to vector<64x256xf32>
    %175 = vector.broadcast %83 : vector<1x256xf32> to vector<64x256xf32>
    %176 = arith.mulf %175, %174 : vector<64x256xf32>
    %177 = arith.addf %172, %176 : vector<64x256xf32>
    %c71_i32_46 = arith.constant 71 : i32
    %178 = tpu.dynamic_rotate %164 by %c71_i32_46 dim 0 : vector<88x256xf32>, i32 -> vector<88x256xf32>
    %179 = vector.extract_strided_slice %178 {offsets = [0, 0], sizes = [64, 256], strides = [1, 1]} : vector<88x256xf32> to vector<64x256xf32>
    %180 = vector.broadcast %68 : vector<1x256xf32> to vector<64x256xf32>
    %181 = arith.mulf %180, %179 : vector<64x256xf32>
    %182 = arith.addf %177, %181 : vector<64x256xf32>
    %c0_47 = arith.constant 0 : index
    %183 = arith.index_cast %c1_i32_42 : i32 to index
    %c0_48 = arith.constant 0 : index
    %c0_49 = arith.constant 0 : index
    %184 = vector.load %arg3[%c0_47, %183, %c0_48, %c0_49] : memref<1x4x3x64xf32, #tpu.memory_space<vmem>>, vector<1x1x3x64xf32>
    %185 = vector.shape_cast %184 : vector<1x1x3x64xf32> to vector<3x64xf32>
    %cst_50 = arith.constant dense<0.000000e+00> : vector<3x256xf32>
    %186 = tpu.matmul %185, %182, %cst_50 {dimension_numbers = #tpu.dot_dimension_numbers<[1], [0], [0], [1], [0, 0, 1, 1], [], []>} : vector<3x64xf32>, vector<64x256xf32>, vector<3x256xf32> -> vector<3x256xf32>
    %187 = arith.addf %157, %186 : vector<3x256xf32>
    %c2_i32 = arith.constant 2 : i32
    %c64_i32_51 = arith.constant 64 : i32
    %188 = arith.muli %c2_i32, %c64_i32_51 : i32
    %189 = vector.broadcast %188 : i32 to vector<1x256xi32>
    %190 = arith.subi %125, %189 : vector<1x256xi32>
    %191 = vector.broadcast %190 : vector<1x256xi32> to vector<88x256xi32>
    %192 = arith.cmpi eq, %126, %191 : vector<88x256xi32>
    %193 = arith.extui %192 : vector<88x256xi1> to vector<88x256xi32>
    %194 = arith.sitofp %193 : vector<88x256xi32> to vector<88x256xf32>
    %195 = vector.extract_strided_slice %194 {offsets = [0, 0], sizes = [64, 256], strides = [1, 1]} : vector<88x256xf32> to vector<64x256xf32>
    %196 = vector.broadcast %113 : vector<1x256xf32> to vector<64x256xf32>
    %197 = arith.mulf %196, %195 : vector<64x256xf32>
    %c87_i32_52 = arith.constant 87 : i32
    %198 = tpu.dynamic_rotate %194 by %c87_i32_52 dim 0 : vector<88x256xf32>, i32 -> vector<88x256xf32>
    %199 = vector.extract_strided_slice %198 {offsets = [0, 0], sizes = [64, 256], strides = [1, 1]} : vector<88x256xf32> to vector<64x256xf32>
    %200 = vector.broadcast %98 : vector<1x256xf32> to vector<64x256xf32>
    %201 = arith.mulf %200, %199 : vector<64x256xf32>
    %202 = arith.addf %197, %201 : vector<64x256xf32>
    %c72_i32_53 = arith.constant 72 : i32
    %203 = tpu.dynamic_rotate %194 by %c72_i32_53 dim 0 : vector<88x256xf32>, i32 -> vector<88x256xf32>
    %204 = vector.extract_strided_slice %203 {offsets = [0, 0], sizes = [64, 256], strides = [1, 1]} : vector<88x256xf32> to vector<64x256xf32>
    %205 = vector.broadcast %83 : vector<1x256xf32> to vector<64x256xf32>
    %206 = arith.mulf %205, %204 : vector<64x256xf32>
    %207 = arith.addf %202, %206 : vector<64x256xf32>
    %c71_i32_54 = arith.constant 71 : i32
    %208 = tpu.dynamic_rotate %194 by %c71_i32_54 dim 0 : vector<88x256xf32>, i32 -> vector<88x256xf32>
    %209 = vector.extract_strided_slice %208 {offsets = [0, 0], sizes = [64, 256], strides = [1, 1]} : vector<88x256xf32> to vector<64x256xf32>
    %210 = vector.broadcast %68 : vector<1x256xf32> to vector<64x256xf32>
    %211 = arith.mulf %210, %209 : vector<64x256xf32>
    %212 = arith.addf %207, %211 : vector<64x256xf32>
    %c0_55 = arith.constant 0 : index
    %213 = arith.index_cast %c2_i32 : i32 to index
    %c0_56 = arith.constant 0 : index
    %c0_57 = arith.constant 0 : index
    %214 = vector.load %arg3[%c0_55, %213, %c0_56, %c0_57] : memref<1x4x3x64xf32, #tpu.memory_space<vmem>>, vector<1x1x3x64xf32>
    %215 = vector.shape_cast %214 : vector<1x1x3x64xf32> to vector<3x64xf32>
    %cst_58 = arith.constant dense<0.000000e+00> : vector<3x256xf32>
    %216 = tpu.matmul %215, %212, %cst_58 {dimension_numbers = #tpu.dot_dimension_numbers<[1], [0], [0], [1], [0, 0, 1, 1], [], []>} : vector<3x64xf32>, vector<64x256xf32>, vector<3x256xf32> -> vector<3x256xf32>
    %217 = arith.addf %187, %216 : vector<3x256xf32>
    %c3_i32 = arith.constant 3 : i32
    %c64_i32_59 = arith.constant 64 : i32
    %218 = arith.muli %c3_i32, %c64_i32_59 : i32
    %219 = vector.broadcast %218 : i32 to vector<1x256xi32>
    %220 = arith.subi %125, %219 : vector<1x256xi32>
    %221 = vector.broadcast %220 : vector<1x256xi32> to vector<88x256xi32>
    %222 = arith.cmpi eq, %126, %221 : vector<88x256xi32>
    %223 = arith.extui %222 : vector<88x256xi1> to vector<88x256xi32>
    %224 = arith.sitofp %223 : vector<88x256xi32> to vector<88x256xf32>
    %225 = vector.extract_strided_slice %224 {offsets = [0, 0], sizes = [64, 256], strides = [1, 1]} : vector<88x256xf32> to vector<64x256xf32>
    %226 = vector.broadcast %113 : vector<1x256xf32> to vector<64x256xf32>
    %227 = arith.mulf %226, %225 : vector<64x256xf32>
    %c87_i32_60 = arith.constant 87 : i32
    %228 = tpu.dynamic_rotate %224 by %c87_i32_60 dim 0 : vector<88x256xf32>, i32 -> vector<88x256xf32>
    %229 = vector.extract_strided_slice %228 {offsets = [0, 0], sizes = [64, 256], strides = [1, 1]} : vector<88x256xf32> to vector<64x256xf32>
    %230 = vector.broadcast %98 : vector<1x256xf32> to vector<64x256xf32>
    %231 = arith.mulf %230, %229 : vector<64x256xf32>
    %232 = arith.addf %227, %231 : vector<64x256xf32>
    %c72_i32_61 = arith.constant 72 : i32
    %233 = tpu.dynamic_rotate %224 by %c72_i32_61 dim 0 : vector<88x256xf32>, i32 -> vector<88x256xf32>
    %234 = vector.extract_strided_slice %233 {offsets = [0, 0], sizes = [64, 256], strides = [1, 1]} : vector<88x256xf32> to vector<64x256xf32>
    %235 = vector.broadcast %83 : vector<1x256xf32> to vector<64x256xf32>
    %236 = arith.mulf %235, %234 : vector<64x256xf32>
    %237 = arith.addf %232, %236 : vector<64x256xf32>
    %c71_i32_62 = arith.constant 71 : i32
    %238 = tpu.dynamic_rotate %224 by %c71_i32_62 dim 0 : vector<88x256xf32>, i32 -> vector<88x256xf32>
    %239 = vector.extract_strided_slice %238 {offsets = [0, 0], sizes = [64, 256], strides = [1, 1]} : vector<88x256xf32> to vector<64x256xf32>
    %240 = vector.broadcast %68 : vector<1x256xf32> to vector<64x256xf32>
    %241 = arith.mulf %240, %239 : vector<64x256xf32>
    %242 = arith.addf %237, %241 : vector<64x256xf32>
    %c0_63 = arith.constant 0 : index
    %243 = arith.index_cast %c3_i32 : i32 to index
    %c0_64 = arith.constant 0 : index
    %c0_65 = arith.constant 0 : index
    %244 = vector.load %arg3[%c0_63, %243, %c0_64, %c0_65] : memref<1x4x3x64xf32, #tpu.memory_space<vmem>>, vector<1x1x3x64xf32>
    %245 = vector.shape_cast %244 : vector<1x1x3x64xf32> to vector<3x64xf32>
    %cst_66 = arith.constant dense<0.000000e+00> : vector<3x256xf32>
    %246 = tpu.matmul %245, %242, %cst_66 {dimension_numbers = #tpu.dot_dimension_numbers<[1], [0], [0], [1], [0, 0, 1, 1], [], []>} : vector<3x64xf32>, vector<64x256xf32>, vector<3x256xf32> -> vector<3x256xf32>
    %247 = arith.addf %217, %246 : vector<3x256xf32>
    %c4_i32 = arith.constant 4 : i32
    %248 = vector.broadcast %120 : vector<1x256xf32> to vector<3x256xf32>
    %249 = arith.mulf %247, %248 : vector<3x256xf32>
    %c0_67 = arith.constant 0 : index
    %c0_68 = arith.constant 0 : index
    %c0_69 = arith.constant 0 : index
    %250 = vector.load %arg2[%c0_67, %c0_68, %c0_69] : memref<1x3x256xf32, #tpu.memory_space<vmem>>, vector<1x3x256xf32>
    %251 = vector.shape_cast %250 : vector<1x3x256xf32> to vector<3x256xf32>
    %252 = vector.broadcast %120 : vector<1x256xf32> to vector<3x256xf32>
    %253 = arith.mulf %251, %252 : vector<3x256xf32>
    %c0_70 = arith.constant 0 : index
    %c0_71 = arith.constant 0 : index
    %c0_72 = arith.constant 0 : index
    %254 = vector.load %arg4[%c0_70, %c0_71, %c0_72] : memref<1x3x256xf32, #tpu.memory_space<vmem>>, vector<1x3x256xf32>
    %255 = vector.shape_cast %254 : vector<1x3x256xf32> to vector<3x256xf32>
    %256 = vector.shape_cast %249 : vector<3x256xf32> to vector<1x3x256xf32>
    tpu.vector_store %arg4[%c0_70, %c0_71, %c0_72], %256 {strides = array<i32>} : memref<1x3x256xf32, #tpu.memory_space<vmem>>, vector<1x3x256xf32>,
    %257 = arith.subf %249, %253 : vector<3x256xf32>
    %258 = math.absf %257 : vector<3x256xf32>
    %259 = vector.shape_cast %258 : vector<3x256xf32> to vector<1x3x256xf32>
    %cst_73 = arith.constant dense<0.000000e+00> : vector<1xf32>
    %260 = vector.multi_reduction <add>, %259, %cst_73 [1, 2] : vector<1x3x256xf32> to vector<1xf32>
    %261 = vector.shape_cast %260 : vector<1xf32> to vector<1x1x1xf32>
    %262 = vector.extract %261[0, 0, 0] : f32 from vector<1x1x1xf32>
    %263 = vector.broadcast %262 : f32 to vector<1x1x1xf32>
    %c0_74 = arith.constant 0 : index
    %c0_75 = arith.constant 0 : index
    %c0_76 = arith.constant 0 : index
    %264 = vector.load %arg5[%c0_74, %c0_75, %c0_76] : memref<1x1x1xf32, #tpu.memory_space<vmem>>, vector<1x1x1xf32>
    tpu.vector_store %arg5[%c0_74, %c0_75, %c0_76], %263 {strides = array<i32>} : memref<1x1x1xf32, #tpu.memory_space<vmem>>, vector<1x1x1xf32>,
    return
  }
  func.func @transform_0(%arg0: i32) -> (i32, i32, i32) {
    %c0_i32 = arith.constant 0 : i32
    %c0_i32_0 = arith.constant 0 : i32
    %c0_i32_1 = arith.constant 0 : i32
    return %arg0, %c0_i32, %c0_i32_0 : i32, i32, i32
  }
  func.func @transform_1(%arg0: i32) -> (i32, i32, i32) {
    %c0_i32 = arith.constant 0 : i32
    %c0_i32_0 = arith.constant 0 : i32
    %c0_i32_1 = arith.constant 0 : i32
    return %arg0, %c0_i32, %c0_i32_0 : i32, i32, i32
  }
  func.func @transform_2(%arg0: i32) -> (i32, i32, i32, i32) {
    %c0_i32 = arith.constant 0 : i32
    %c0_i32_0 = arith.constant 0 : i32
    %c0_i32_1 = arith.constant 0 : i32
    %c0_i32_2 = arith.constant 0 : i32
    return %arg0, %c0_i32, %c0_i32_0, %c0_i32_1 : i32, i32, i32, i32
  }
  func.func @transform_3(%arg0: i32) -> (i32, i32, i32) {
    %c0_i32 = arith.constant 0 : i32
    %c0_i32_0 = arith.constant 0 : i32
    %c0_i32_1 = arith.constant 0 : i32
    return %arg0, %c0_i32, %c0_i32_0 : i32, i32, i32
  }
  func.func @transform_4(%arg0: i32) -> (i32, i32, i32) {
    %c0_i32 = arith.constant 0 : i32
    %c0_i32_0 = arith.constant 0 : i32
    %c0_i32_1 = arith.constant 0 : i32
    return %arg0, %c0_i32, %c0_i32_0 : i32, i32, i32
  }
}

</mosaic_0001>

<bundles_post_ra>
// kernel: tpu_custom_call.1
= control target key start
LH: loop header
LB: loop body
LE: loop exit
PB: predicated region body
PF: predicated region fallthrough
CT: control target
= control target key end

     0   :  { %s2034_s15 = smov 0   ;;  %s3581_s0 = inlined_call_operand.vmem [shape: f32[2,2,256], index: 0, kind: input, shape index: {}]   ;;  %s3582_s1 = inlined_call_operand.vmem [shape: f32[2,3,256], index: 1, kind: input, shape index: {}]   ;;  %s3583_s2 = inlined_call_operand.vmem [shape: f32[2,4,3,64], index: 2, kind: input, shape index: {}]   ;;  %s3584_s3 = inlined_call_operand.vmem [shape: f32[2,3,256], index: 3, kind: output, shape index: {0}]   ;;  %s3585_s4 = inlined_call_operand.vmem [shape: f32[2,1,1], index: 4, kind: output, shape index: {1}]  }
   0x1 LB: > { %s1846_s16 = sadd.s32 4294967295, %s2006_s15   ;;  %p1850_p0 = scmp.ge.s32.totalorder %s2006_s15, 1  ;;  %s2006_s15 = sphi %s2034_s15, %s15_s15  }
   0x2   : > { %p185_p1 = scmp.lt.s32.totalorder %s2006_s15, 3 }
   0x4   : > { %p186_p2 = pnand %p1850_p0, %p185_p1 }
   0x6   : > { %189 = sbr.rel (%p186_p2) target bundleno = 671 (0x29f), region = 32 }
   0xb   : > { %p224_p3 = scmp.lt.s32.totalorder %s1846_s16, 1  ;;  %v247_v0 = vlaneseq  ;;  %v3590_v1 = vmov 0.0  }
   0xc   : > { %1001 = vmatprep.mubr.f32.mxu0 %v3590_v1  ;;  %1075 = vmatprep.mubr.f32.mxu1 %v3590_v1 }
   0xd   : > { %s3660_s16 = smov (!%p224_p3, %s1846_s16), 1  ;;  %v248_v2 = vand.u32 127, %v247_v0  ;;  %v2046_v3 = vshrl.u32 %v247_v0, 7 }
   0xe   : > { %s1977_s17 = sshll.u32 %s3660_s16, 2  ;;  %s1979_s21 = sshll.u32 %s3660_s16, 4 }
   0xf   : > { %v249_v4 = vadd.s32 128, %v248_v2  ;;  %v2050_v5 = vsub.s32 0, %v2046_v3  ;;  %v286_v6 = vsub.s32 1, %v2046_v3  ;;  %s228_s20 = scalar_lea.vmem %s3581_s0, %s1977_s17  ;;  %v254_v9 = vand.u32 15, %v248_v2  ;;  %s2909_s24 = scalar_lea.vmem %s3583_s2, %s1979_s21 }
  0x10   : > { %v276_v8 = vld [vmem:[%s228_s20] ss:$2 sm:$0x3]  ;;  %v1859_v10 = vld [vmem:[%s228_s20 + $0x1] ss:$2 sm:$0x3]  ;;  %s246_s8 = scalar_lea.vmem %s3585_s4, %s3660_s16 }
  0x11   : > { %v261_v7 = vand.u32 15, %v249_v4  ;;  %v287_v11 = vrot.slane %v276_v8, %v286_v6  ;;  %v283_v12 = vrot.slane %v276_v8, %v2050_v5  ;;  %v300_v14 = vrot.slane %v1859_v10, %v286_v6  ;;  %s1978_s25 = sshll.u32 %s3660_s16, 3 }
  0x12   : > { %v274_v15 = vcvt.s32.f32 %v254_v9  ;;  %v296_v16 = vrot.slane %v1859_v10, %v2050_v5  ;;  %v2059_v37 = vadd.s32 56, %v2046_v3  ;;  %v2062_v38 = vadd.s32 64, %v2046_v3  ;;  %s233_s28 = scalar_lea.vmem %s3582_s1, %s1978_s25  ;;  %s243_s5 = scalar_lea.vmem %s3584_s3, %s1978_s25 }
  0x13   : > { %v275_v13 = vcvt.s32.f32 %v261_v7  ;;  %v2065_v39 = vadd.s32 72, %v2046_v3  ;;  %v2068_v40 = vadd.s32 80, %v2046_v3  ;;  %v2071_v44 = vadd.s32 48, %v2046_v3 }
  0x14   : > { %v290_v19 = vsub.f32 %v274_v15, %v283_v12  ;;  %v303_v20 = vsub.f32 %v274_v15, %v296_v16  ;;  %3610 = vst [vmem:[#allocation2_spill] sm:$0xff] %v2059_v37  ;;  %3611 = vst [vmem:[#allocation3_spill] sm:$0xff] %v2062_v38  ;;  %v2074_v46 = vadd.s32 40, %v2046_v3  ;;  %v2077_v47 = vadd.s32 32, %v2046_v3 }
  0x15   : > { %v291_v17 = vsub.f32 %v275_v13, %v287_v11  ;;  %v304_v18 = vsub.f32 %v275_v13, %v300_v14  ;;  %3612 = vst [vmem:[#allocation4_spill] sm:$0xff] %v2065_v39  ;;  %3613 = vst [vmem:[#allocation5_spill] sm:$0xff] %v2068_v40  ;;  %v2080_v48 = vadd.s32 24, %v2046_v3  ;;  %v2085_v56 = vadd.s32 16, %v2046_v3 }
  0x16   : > { %v305_v23 = vadd.f32 1.0, %v290_v19  ;;  %v313_v24 = vadd.f32 1.0, %v303_v20  ;;  %v2088_v60 = vadd.s32 8, %v2046_v3 }
  0x17   : > { %v306_v21 = vadd.f32 1.0, %v291_v17  ;;  %v314_v22 = vadd.f32 1.0, %v304_v18 }
  0x18   : > { %v307_v27 = vmul.f32 16.0, %v305_v23  ;;  %v315_v28 = vmul.f32 16.0, %v313_v24 }
  0x19   : > { %v308_v25 = vmul.f32 16.0, %v306_v21  ;;  %v316_v26 = vmul.f32 16.0, %v314_v22 }
  0x1a   : > { %v1860_v31 = vadd.f32 -1.0, %v307_v27  ;;  %v1862_v32 = vadd.f32 -1.0, %v315_v28 }
  0x1b   : > { %v1861_v29 = vadd.f32 -1.0, %v308_v25  ;;  %v1863_v30 = vadd.f32 -1.0, %v316_v26 }
  0x1c   : > { %v311_v35 = vmul.f32 0.5, %v1860_v31  ;;  %v319_v36 = vmul.f32 0.5, %v1862_v32 }
  0x1d   : > { %v312_v33 = vmul.f32 0.5, %v1861_v29  ;;  %v320_v34 = vmul.f32 0.5, %v1863_v30 }
  0x1e   : > { %v321_v43 = vfloor.f32 %v311_v35  ;;  %v323_v45 = vfloor.f32 %v319_v36 }
  0x1f   : > { %v322_v41 = vfloor.f32 %v312_v33  ;;  %v324_v42 = vfloor.f32 %v320_v34 }
  0x20   : > { %v2082_v53 = vsub.f32 %v311_v35, %v321_v43  ;;  %v329_v54 = vsub.f32 %v319_v36, %v323_v45  ;;  %v1981_v55 = vtrunc.f32 %v321_v43  ;;  %v1985_v0 = vtrunc.f32 %v323_v45 }
  0x21   : > { %v326_v49 = vsub.f32 %v312_v33, %v322_v41  ;;  %v330_v50 = vsub.f32 %v320_v34, %v324_v42  ;;  %v1983_v51 = vtrunc.f32 %v322_v41  ;;  %v1987_v52 = vtrunc.f32 %v324_v42 }
  0x22   : > { %v327_v63 = vsub.f32 1.0, %v2082_v53  ;;  %v331_v6 = vsub.f32 1.0, %v329_v54  ;;  %v1982_v8 = vcvt.f32.s32 %v1981_v55  ;;  %v2100_v13 = vcvt.f32.s32 %v1985_v0 }
  0x23   : > { %v332_v57 = vsub.f32 1.0, %v330_v50  ;;  %v1984_v58 = vcvt.f32.s32 %v1983_v51  ;;  %v1988_v59 = vcvt.f32.s32 %v1987_v52  ;;  %v328_v61 = vsub.f32 1.0, %v326_v49 }
  0x24   : > { %v2090_v62 = vmul.f32 %v330_v50, %v326_v49  ;;  %v337_v14 = vadd.s32 1, %v1982_v8  ;;  %v2103_v15 = vmul.f32 %v331_v6, %v327_v63  ;;  %vm343_vm11 = vcmp.ge.s32.totalorder %v1982_v8, 0 }
  0x25   : > { %v338_v2 = vadd.s32 1, %v1984_v58  ;;  %v340_v4 = vadd.s32 1, %v1988_v59  ;;  %vm344_vm0 = vcmp.ge.s32.totalorder %v1984_v58, 0  ;;  %v342_v7 = vmul.f32 %v332_v57, %v328_v61 }
  0x26   : > { %vm346_vm1 = vcmp.lt.s32.totalorder %v1984_v58, 16  ;;  %vm350_vm2 = vcmp.ge.s32.totalorder %v1988_v59, 0  ;;  %vm354_vm4 = vcmp.lt.s32.totalorder %v1988_v59, 16  ;;  %v364_v10 = vmul.f32 %v332_v57, %v326_v49 }
  0x27   : > { %vm2093_vm3 = vmand %vm344_vm0, %vm346_vm1  ;;  %vm366_vm5 = vcmp.ge.s32.totalorder %v338_v2, 0  ;;  %vm368_vm6 = vcmp.lt.s32.totalorder %v338_v2, 16  ;;  %v382_v11 = vmul.f32 %v330_v50, %v328_v61  ;;  %v422_v12 = vmul.u32 16, %v1988_v59 }
  0x28   : > { %vm352_vm7 = vmand %vm2093_vm3, %vm350_vm2  ;;  %vm384_vm9 = vcmp.ge.s32.totalorder %v340_v4, 0  ;;  %vm388_vm10 = vcmp.lt.s32.totalorder %v340_v4, 16  ;;  %v2111_v19 = vadd.s32 1, %v2100_v13  ;;  %vm345_vm13 = vcmp.lt.s32.totalorder %v1982_v8, 16 }
  0x29   : > { %vm356_vm8 = vmand %vm352_vm7, %vm354_vm4  ;;  %v424_v18 = vadd.s32 %v1984_v58, %v422_v12  ;;  %vm349_vm15 = vcmp.ge.s32.totalorder %v2100_v13, 0  ;;  %v2121_v21 = vmul.f32 %v331_v6, %v2082_v53  ;;  %vm367_vm7 = vcmp.lt.s32.totalorder %v337_v14, 16 }
  0x2a   : > { %v1865_v16 = vsel %vm356_vm8, 1.0, %v3590_v1  ;;  %vm2106_vm12 = vmand %vm366_vm5, %vm368_vm6  ;;  %vm555_vm5 = vcmp.lt.s32.totalorder %v2046_v3, 7  ;;  %vm365_vm6 = vcmp.ge.s32.totalorder %v337_v14, 0  ;;  %v2127_v23 = vmul.f32 %v329_v54, %v327_v63 }
  0x2b   : > { %v2113_v20 = vmul.f32 %v1865_v16, %v342_v7  ;;  %vm372_vm14 = vmand %vm2106_vm12, %vm350_vm2  ;;  %v2124_v22 = vadd.s32 17, %v424_v18  ;;  %v421_v25 = vmul.u32 16, %v2100_v13  ;;  %v2153_v31 = vmul.f32 %v329_v54, %v2082_v53 }
  0x2c   : > { %vm374_vm1 = vmand %vm372_vm14, %vm354_vm4  ;;  %vm3624_vm0 = vcmp.lt.s32.totalorder %v2100_v13, 16 }
  0x2d   : > { %3618 = vst [vmem:[#allocation6_spill] sm:$0xff] %v2113_v20  ;;  %v1867_v24 = vsel %vm374_vm1, 1.0, %v3590_v1  ;;  %vm386_vm2 = vmand %vm2093_vm3, %vm384_vm9  ;;  %v2141_v27 = vrot.slane %v2113_v20, %v2050_v5  ;;  %v1897_v28 = vadd.s32 4294967232, %v2124_v22  ;;  %v2146_v29 = vrot.slane %v2124_v22, %v2050_v5 }
  0x2e   : > { %v2136_v26 = vmul.f32 %v1867_v24, %v364_v10  ;;  %vm390_vm4 = vmand %vm386_vm2, %vm388_vm10  ;;  %v2155_v32 = vadd.s32 %v1982_v8, %v421_v25  ;;  %v2158_v33 = vadd.s32 4294967168, %v2124_v22 }
  0x2f   : > { %v1869_v30 = vsel %vm390_vm4, 1.0, %v3590_v1  ;;  %vm400_vm3 = vmand %vm2106_vm12, %vm384_vm9  ;;  %v2168_v36 = vrot.slane %v1897_v28, %v2050_v5  ;;  %vm462_vm9 = vcmp.eq.s32.totalorder %v2059_v37, %v2146_v29  ;;  %vm464_vm12 = vcmp.eq.s32.totalorder %v2062_v38, %v2146_v29 }
  0x30   : > { %3619 = vst [vmem:[#allocation7_spill] sm:$0xff] %v2136_v26  ;;  %v2160_v34 = vmul.f32 %v1869_v30, %v382_v11  ;;  %vm402_vm14 = vmand %vm400_vm3, %vm388_vm10  ;;  %v2165_v35 = vrot.slane %v2136_v26, %v2050_v5  ;;  %vm466_vm1 = vcmp.eq.s32.totalorder %v2065_v39, %v2146_v29  ;;  %vm468_vm10 = vcmp.eq.s32.totalorder %v2068_v40, %v2146_v29 }
  0x31   : > { %v1871_v41 = vsel %vm402_vm14, 1.0, %v3590_v1  ;;  %vm2181_vm2 = vmand %vm343_vm11, %vm345_vm13  ;;  %vm726_vm4 = vcmp.eq.s32.totalorder %v2059_v37, %v2168_v36  ;;  %vm728_vm3 = vcmp.eq.s32.totalorder %v2062_v38, %v2168_v36  ;;  %vm730_vm13 = vcmp.eq.s32.totalorder %v2065_v39, %v2168_v36 }
  0x32   : > { %3620 = vst [vmem:[#allocation8_spill] sm:$0xff] %v2160_v34  ;;  %v2186_v43 = vmul.f32 %v1871_v41, %v2090_v62  ;;  %v2190_v45 = vrot.slane %v2160_v34, %v2050_v5  ;;  %vm351_vm11 = vmand %vm2181_vm2, %vm349_vm15  ;;  %vm732_vm14 = vcmp.eq.s32.totalorder %v2068_v40, %v2168_v36  ;;  %v2205_v49 = vsel %vm726_vm4, 1.0, %v3590_v1 }
  0x33   : > { %v2208_v50 = vsel %vm728_vm3, 1.0, %v3590_v1  ;;  %vm2212_vm8 = vmand %vm351_vm11, %vm3624_vm0  ;;  %v1917_v53 = vsel %vm730_vm13, 1.0, %v3590_v1  ;;  %v1919_v54 = vsel %vm732_vm14, 1.0, %v3590_v1  ;;  %v3587_v55 = vrot.slane %v2205_v49, 1 }
  0x34   : > { %3623 = vst [vmem:[#allocation9_spill] sm:$0xff] %v2186_v43  ;;  %v2218_v52 = vrot.slane %v2186_v43, %v2050_v5  ;;  %vm2225_vm4 = vmand %vm365_vm6, %vm367_vm7  ;;  %v810_v58 = vrot.slane %v2208_v50, 1  ;;  %v874_v59 = vmul.f32 %v1917_v53, %v2165_v35  ;;  %v892_v61 = vrot.slane %v1917_v53, 1 }
  0x35   : > { %v894_v62 = vrot.slane %v1919_v54, 1  ;;  %vm371_vm0 = vmand %vm2225_vm4, %vm349_vm15  ;;  %v2241_v0 = vsel %vm462_vm9, 1.0, %v3590_v1  ;;  %v2247_v2 = vsel %vm464_vm12, 1.0, %v3590_v1  ;;  %v2253_v4 = vsel %vm466_vm1, 1.0, %v3590_v1 }
  0x36   : > { %v792_v63 = vmul.f32 %v2205_v49, %v2218_v52  ;;  %vm3629_vm15 = vcmp.lt.s32.totalorder %v2100_v13, 16  ;;  %v2265_v7 = vsel %vm555_vm5, %v3587_v55, %v810_v58  ;;  %v1895_v9 = vsel %vm468_vm10, 1.0, %v3590_v1 }
  0x37   : > { %vm2257_vm6 = vmand %vm371_vm0, %vm3629_vm15  ;;  %v896_v8 = vsel %vm555_vm5, %v892_v61, %v894_v62  ;;  %v536_v10 = vmul.f32 %v2241_v0, %v2218_v52  ;;  %vm3632_vm7 = vcmp.ge.s32.totalorder %v2111_v19, 0  ;;  %v842_v11 = vmul.f32 %v2265_v7, %v2190_v45 }
  0x38   : > { %vm385_vm9 = vmand %vm2181_vm2, %vm3632_vm7  ;;  %v914_v12 = vmul.f32 %v896_v8, %v2141_v27  ;;  %v3586_v13 = vrot.slane %v2241_v0, 1  ;;  %v3588_v14 = vrot.slane %v2247_v2, 1  ;;  %vm3633_vm12 = vcmp.lt.s32.totalorder %v2111_v19, 16 }
  0x39   : > { %vm389_vm1 = vmand %vm385_vm9, %vm3633_vm12  ;;  %v635_v16 = vmul.f32 %v2253_v4, %v2165_v35  ;;  %v3589_v17 = vrot.slane %v2253_v4, 1  ;;  %v655_v18 = vrot.slane %v1895_v9, 1  ;;  %v1864_v24 = vsel %vm2212_vm8, 1.0, %v3590_v1 }
  0x3a   : > { %vm3634_vm10 = vmmov %vm3632_vm7  ;;  %v858_v25 = vadd.f32 %v842_v11, %v792_v63  ;;  %v2302_v28 = vsel %vm555_vm5, %v3586_v13, %v3588_v14  ;;  %v2305_v30 = vmul.f32 %v1864_v24, %v2103_v15  ;;  %v1866_v41 = vsel %vm2257_vm6, 1.0, %v3590_v1 }
  0x3b   : > { %vm399_vm2 = vmand %vm2225_vm4, %vm3634_vm10  ;;  %v595_v42 = vmul.f32 %v2190_v45, %v2302_v28  ;;  %v657_v51 = vsel %vm555_vm5, %v3589_v17, %v655_v18  ;;  %v2319_v53 = vmul.f32 %v1866_v41, %v2121_v21  ;;  %v1868_v15 = vsel %vm389_vm1, 1.0, %v3590_v1 }
  0x3c   : > { %3635 = vst [vmem:[#allocation10_spill] sm:$0xff] %v2305_v30  ;;  %vm3636_vm8 = vmmov %vm3633_vm12  ;;  %v890_v54 = vadd.f32 %v874_v59, %v858_v25  ;;  %v2323_v57 = vmul.f32 %v1868_v15, %v2127_v23  ;;  %v2327_v62 = vadd.s32 4294967104, %v2124_v22  ;;  %v683_v6 = vmul.f32 %v2141_v27, %v657_v51 }
  0x3d   : > { %vm401_vm3 = vmand %vm399_vm2, %vm3636_vm8  ;;  %3637 = vst [vmem:[#allocation11_spill] sm:$0xff] %v2319_v53  ;;  %v611_v63 = vadd.f32 %v595_v42, %v536_v10  ;;  %v2334_v21 = vadd.s32 17, %v2155_v32  ;;  %v2342_v23 = vrot.slane %v2319_v53, %v2050_v5  ;;  %vm724_vm11 = vcmp.eq.s32.totalorder %v2071_v44, %v2168_v36 }
  0x3e   : > { %3638 = vst [vmem:[#allocation12_spill] sm:$0xff] %v2323_v57  ;;  %v1870_v19 = vsel %vm401_vm3, 1.0, %v3590_v1  ;;  %v930_v9 = vadd.f32 %v914_v12, %v890_v54  ;;  %v2338_v59 = vrot.slane %v2323_v57, %v2050_v5  ;;  %v2360_v12 = vsel %vm724_vm11, 1.0, %v3590_v1 }
  0x3f   : > { %v2331_v8 = vmul.f32 %v1870_v19, %v2153_v31  ;;  %3640 = vst [vmem:[#allocation14_spill] sm:$0xff] %v2334_v21  ;;  %v651_v22 = vadd.f32 %v635_v16, %v611_v63  ;;  %v2348_v31 = vrot.slane %v2305_v30, %v2050_v5  ;;  %v1896_v32 = vadd.s32 4294967232, %v2334_v21 }
  0x40   : > { %v2353_v10 = vrot.slane %v2334_v21, %v2050_v5  ;;  %953 = vmatprep.subr.mxu0 %v930_v9  ;;  %v2364_v16 = vmul.f32 %v2208_v50, %v2165_v35  ;;  %v898_v18 = vsel %vm555_vm5, %v810_v58, %v892_v61  ;;  %vm460_vm12 = vcmp.eq.s32.totalorder %v2071_v44, %v2146_v29 }
  0x41   : > { %3639 = vst [vmem:[#allocation13_spill] sm:$0xff] %v2331_v8  ;;  %v2357_v11 = vrot.slane %v2331_v8, %v2050_v5  ;;  %v699_v24 = vadd.f32 %v683_v6, %v651_v22  ;;  %v2369_v25 = vrot.slane %v1896_v32, %v2050_v5  ;;  %v806_v20 = vrot.slane %v2360_v12, 1 }
  0x42   : > { %vm461_vm13 = vcmp.eq.s32.totalorder %v2059_v37, %v2353_v10  ;;  %vm463_vm14 = vcmp.eq.s32.totalorder %v2062_v38, %v2353_v10  ;;  %vm465_vm4 = vcmp.eq.s32.totalorder %v2065_v39, %v2353_v10  ;;  %vm467_vm0 = vcmp.eq.s32.totalorder %v2068_v40, %v2353_v10 }
  0x43   : > { %v2380_v50 = vsel %vm461_vm13, 1.0, %v3590_v1  ;;  %v2383_v58 = vsel %vm463_vm14, 1.0, %v3590_v1  ;;  %1027 = vmatprep.subr.mxu1 %v699_v24  ;;  %vm725_vm15 = vcmp.eq.s32.totalorder %v2059_v37, %v2369_v25  ;;  %vm727_vm6 = vcmp.eq.s32.totalorder %v2062_v38, %v2369_v25 }
  0x44   : > { %vm729_vm7 = vcmp.eq.s32.totalorder %v2065_v39, %v2369_v25  ;;  %vm731_vm9 = vcmp.eq.s32.totalorder %v2068_v40, %v2369_v25  ;;  %v2394_v61 = vsel %vm725_vm15, 1.0, %v3590_v1  ;;  %v1914_v41 = vsel %vm727_vm6, 1.0, %v3590_v1 }
  0x45   : > { %v1916_v42 = vsel %vm729_vm7, 1.0, %v3590_v1  ;;  %v1918_v51 = vsel %vm731_vm9, 1.0, %v3590_v1  ;;  %v791_v15 = vmul.f32 %v2394_v61, %v2357_v11  ;;  %v807_v54 = vrot.slane %v2394_v61, 1 }
  0x46   : > { %v809_v19 = vrot.slane %v1914_v41, 1  ;;  %v891_v63 = vrot.slane %v1916_v42, 1  ;;  %v893_v6 = vrot.slane %v1918_v51, 1  ;;  %v1892_v9 = vsel %vm465_vm4, 1.0, %v3590_v1 }
  0x47   : > { %v1894_v22 = vsel %vm467_vm0, 1.0, %v3590_v1  ;;  %v873_v24 = vmul.f32 %v1916_v42, %v2342_v23  ;;  %v551_v13 = vrot.slane %v2380_v50, 1  ;;  %v553_v51 = vrot.slane %v2383_v58, 1 }
  0x48   : > { %v2414_v32 = vsel %vm555_vm5, %v807_v54, %v809_v19  ;;  %v895_v14 = vsel %vm555_vm5, %v891_v63, %v893_v6  ;;  %v535_v17 = vmul.f32 %v2380_v50, %v2357_v11  ;;  %v652_v1 = vrot.slane %v1892_v9, 1 }
  0x49   : > { %v841_v55 = vmul.f32 %v2414_v32, %v2338_v59  ;;  %v913_v43 = vmul.f32 %v895_v14, %v2348_v31  ;;  %v2428_v8 = vsel %vm555_vm5, %v551_v13, %v553_v51  ;;  %v634_v42 = vmul.f32 %v1892_v9, %v2342_v23 }
  0x4a   : > { %v654_v34 = vrot.slane %v1894_v22, 1  ;;  %v594_v26 = vmul.f32 %v2338_v59, %v2428_v8  ;;  %v790_v6 = vmul.f32 %v2360_v12, %v2218_v52  ;;  %v912_v14 = vmul.f32 %v898_v18, %v2141_v27 }
  0x4b   : > { %v857_v57 = vadd.f32 %v841_v55, %v791_v15  ;;  %v3641_v30 = vmov 0.0   ;;  %v3642_v55 = vrot.slane %v2253_v4, 1  ;;  %v3643_v15 = vrot.slane %v2247_v2, 1 }
  0x4c   : > { %v656_v53 = vsel %vm555_vm5, %v652_v1, %v654_v34  ;;  %v2443_v9 = vsel %vm460_vm12, 1.0, %v3641_v30  ;;  %v610_v39 = vadd.f32 %v594_v26, %v535_v17  ;;  %v3644_v34 = vrot.slane %v2205_v49, 1 }
  0x4d   : > { %v659_v22 = vsel %vm555_vm5, %v3643_v15, %v3642_v55  ;;  %v889_v40 = vadd.f32 %v873_v24, %v857_v57  ;;  %v682_v38 = vmul.f32 %v2348_v31, %v656_v53  ;;  %v534_v4 = vmul.f32 %v2443_v9, %v2218_v52 }
  0x4e   : > { %v2456_v18 = vsel %vm555_vm5, %v806_v20, %v3644_v34  ;;  %v550_v21 = vrot.slane %v2443_v9, 1  ;;  %v633_v57 = vmul.f32 %v2247_v2, %v2165_v35  ;;  %v650_v17 = vadd.f32 %v634_v42, %v610_v39 }
  0x4f   : > { %v840_v37 = vmul.f32 %v2456_v18, %v2190_v45  ;;  %v929_v26 = vadd.f32 %v913_v43, %v889_v40  ;;  %v681_v53 = vmul.f32 %v2141_v27, %v659_v22  ;;  %vm723_vm1 = vcmp.eq.s32.totalorder %v2071_v44, %v2369_v25 }
  0x50   : > { %v3645_v55 = vrot.slane %v2241_v0, 1  ;;  %v2475_v34 = vsel %vm723_vm1, 1.0, %v3641_v30  ;;  %v897_v2 = vsel %vm555_vm5, %v809_v19, %v891_v63  ;;  %v698_v39 = vadd.f32 %v682_v38, %v650_v17 }
  0x51   : > { %v856_v24 = vadd.f32 %v840_v37, %v790_v6  ;;  %954 = vmatpush1.msra.mxu0 %v929_v26  ;;  %v805_v43 = vrot.slane %v2475_v34, 1  ;;  %v871_v37 = vmul.f32 %v1914_v41, %v2342_v23  ;;  %v789_v6 = vmul.f32 %v2475_v34, %v2357_v11 }
  0x52   : > { %v2472_v15 = vsel %vm555_vm5, %v550_v21, %v3645_v55  ;;  %v911_v22 = vmul.f32 %v897_v2, %v2348_v31  ;;  %vm459_vm10 = vcmp.eq.s32.totalorder %v2071_v44, %v2353_v10  ;;  %1028 = vmatpush1.msra.mxu1 %v698_v39  ;;  %vm722_vm2 = vcmp.eq.s32.totalorder %v2074_v46, %v2168_v36 }
  0x53   : > { %v593_v40 = vmul.f32 %v2190_v45, %v2472_v15  ;;  %v888_v42 = vadd.f32 %v2364_v16, %v856_v24  ;;  %v2491_v38 = vsel %vm555_vm5, %v805_v43, %v807_v54  ;;  %v2494_v63 = vsel %vm459_vm10, 1.0, %v3641_v30 }
  0x54   : > { %v658_v16 = vsel %vm555_vm5, %v553_v51, %v652_v1  ;;  %v839_v26 = vmul.f32 %v2491_v38, %v2338_v59  ;;  %v549_v17 = vrot.slane %v2494_v63, 1  ;;  %v632_v24 = vmul.f32 %v2383_v58, %v2342_v23 }
  0x55   : > { %v609_v19 = vadd.f32 %v593_v40, %v534_v4  ;;  %v928_v41 = vadd.f32 %v912_v14, %v888_v42  ;;  %v533_v54 = vmul.f32 %v2494_v63, %v2357_v11  ;;  %v680_v55 = vmul.f32 %v2348_v31, %v658_v16 }
  0x56   : > { %v855_v1 = vadd.f32 %v839_v26, %v789_v6  ;;  %v2510_v51 = vsel %vm555_vm5, %v549_v17, %v551_v13  ;;  %v2513_v14 = vsel %vm722_vm2, 1.0, %v3641_v30  ;;  %v870_v58 = vmul.f32 %v2205_v49, %v2165_v35 }
  0x57   : > { %v649_v4 = vadd.f32 %v633_v57, %v609_v19  ;;  %955 = vmatprep.subr.mxu0 %v928_v41  ;;  %v592_v2 = vmul.f32 %v2338_v59, %v2510_v51  ;;  %v804_v39 = vrot.slane %v2513_v14, 1  ;;  %v910_v40 = vmul.f32 %v2265_v7, %v2141_v27 }
  0x58   : > { %v887_v42 = vadd.f32 %v871_v37, %v855_v1  ;;  %v788_v13 = vmul.f32 %v2513_v14, %v2218_v52  ;;  %vm458_vm8 = vcmp.eq.s32.totalorder %v2074_v46, %v2146_v29  ;;  %v631_v6 = vmul.f32 %v2241_v0, %v2165_v35 }
  0x59   : > { %v697_v57 = vadd.f32 %v681_v53, %v649_v4  ;;  %v608_v49 = vadd.f32 %v592_v2, %v533_v54  ;;  %v2530_v53 = vsel %vm555_vm5, %v804_v39, %v806_v20  ;;  %v2533_v19 = vsel %vm458_vm8, 1.0, %v3641_v30 }
  0x5a   : > { %vm721_vm3 = vcmp.eq.s32.totalorder %v2074_v46, %v2369_v25  ;;  %v927_v7 = vadd.f32 %v911_v22, %v887_v42  ;;  %v838_v37 = vmul.f32 %v2530_v53, %v2190_v45  ;;  %v548_v16 = vrot.slane %v2533_v19, 1 }
  0x5b   : > { %1029 = vmatprep.subr.mxu1 %v697_v57  ;;  %v679_v0 = vmul.f32 %v2141_v27, %v2302_v28  ;;  %v648_v41 = vadd.f32 %v632_v24, %v608_v49  ;;  %v532_v20 = vmul.f32 %v2533_v19, %v2218_v52  ;;  %v2545_v26 = vsel %vm721_vm3, 1.0, %v3641_v30 }
  0x5c   : > { %v869_v4 = vmul.f32 %v2394_v61, %v2342_v23  ;;  %956 = vmatpush1.msra.mxu0 %v927_v7  ;;  %v854_v22 = vadd.f32 %v838_v37, %v788_v13  ;;  %v2551_v54 = vsel %vm555_vm5, %v548_v16, %v550_v21  ;;  %v803_v1 = vrot.slane %v2545_v26, 1 }
  0x5d   : > { %v909_v28 = vmul.f32 %v2414_v32, %v2348_v31  ;;  %v696_v24 = vadd.f32 %v680_v55, %v648_v41  ;;  %v591_v57 = vmul.f32 %v2190_v45, %v2551_v54  ;;  %v787_v2 = vmul.f32 %v2545_v26, %v2357_v11 }
  0x5e   : > { %vm457_vm11 = vcmp.eq.s32.totalorder %v2074_v46, %v2353_v10  ;;  %v886_v61 = vadd.f32 %v870_v58, %v854_v22  ;;  %v2564_v21 = vsel %vm555_vm5, %v803_v1, %v805_v43  ;;  %v630_v32 = vmul.f32 %v2380_v50, %v2342_v23 }
  0x5f   : > { %v2567_v42 = vsel %vm457_vm11, 1.0, %v3641_v30  ;;  %1030 = vmatpush1.msra.mxu1 %v696_v24  ;;  %v607_v55 = vadd.f32 %v591_v57, %v532_v20  ;;  %v837_v13 = vmul.f32 %v2564_v21, %v2338_v59  ;;  %v678_v58 = vmul.f32 %v2348_v31, %v2428_v8 }
  0x60   : > { %v547_v49 = vrot.slane %v2567_v42, 1  ;;  %v926_v7 = vadd.f32 %v910_v40, %v886_v61  ;;  %v531_v43 = vmul.f32 %v2567_v42, %v2357_v11  ;;  %vm720_vm13 = vcmp.eq.s32.totalorder %v2077_v47, %v2168_v36 }
  0x61   : > { %v868_v50 = vmul.f32 %v2360_v12, %v2165_v35  ;;  %v647_v37 = vadd.f32 %v631_v6, %v607_v55  ;;  %v853_v41 = vadd.f32 %v837_v13, %v787_v2  ;;  %v2587_v22 = vsel %vm720_vm13, 1.0, %v3641_v30 }
  0x62   : > { %v2584_v20 = vsel %vm555_vm5, %v547_v49, %v549_v17  ;;  %957 = vmatprep.subr.mxu0 %v926_v7  ;;  %v802_v40 = vrot.slane %v2587_v22, 1  ;;  %v908_v24 = vmul.f32 %v2456_v18, %v2141_v27  ;;  %vm456_vm14 = vcmp.eq.s32.totalorder %v2077_v47, %v2146_v29 }
  0x63   : > { %v590_v8 = vmul.f32 %v2338_v59, %v2584_v20  ;;  %v695_v12 = vadd.f32 %v679_v0, %v647_v37  ;;  %v885_v6 = vadd.f32 %v869_v4, %v853_v41  ;;  %v786_v17 = vmul.f32 %v2587_v22, %v2218_v52 }
  0x64   : > { %v2599_v57 = vsel %vm456_vm14, 1.0, %v3641_v30  ;;  %v2603_v61 = vsel %vm555_vm5, %v802_v40, %v804_v39  ;;  %v629_v18 = vmul.f32 %v2443_v9, %v2165_v35  ;;  %vm719_vm4 = vcmp.eq.s32.totalorder %v2077_v47, %v2369_v25 }
  0x65   : > { %v606_v2 = vadd.f32 %v590_v8, %v531_v43  ;;  %v546_v55 = vrot.slane %v2599_v57, 1  ;;  %1031 = vmatprep.subr.mxu1 %v695_v12  ;;  %v925_v13 = vadd.f32 %v909_v28, %v885_v6  ;;  %v836_v0 = vmul.f32 %v2603_v61, %v2190_v45 }
  0x66   : > { %v530_v4 = vmul.f32 %v2599_v57, %v2218_v52  ;;  %v677_v43 = vmul.f32 %v2141_v27, %v2472_v15  ;;  %v2621_v9 = vsel %vm719_vm4, 1.0, %v3641_v30  ;;  %v907_v15 = vmul.f32 %v2491_v38, %v2348_v31 }
  0x67   : > { %v646_v7 = vadd.f32 %v630_v32, %v606_v2  ;;  %v2616_v39 = vsel %vm555_vm5, %v546_v55, %v548_v16  ;;  %958 = vmatpush1.msra.mxu0 %v925_v13  ;;  %v852_v28 = vadd.f32 %v836_v0, %v786_v17  ;;  %v801_v41 = vrot.slane %v2621_v9, 1 }
  0x68   : > { %v589_v37 = vmul.f32 %v2190_v45, %v2616_v39  ;;  %v867_v32 = vmul.f32 %v2475_v34, %v2342_v23  ;;  %v785_v16 = vmul.f32 %v2621_v9, %v2357_v11  ;;  %vm455_vm0 = vcmp.eq.s32.totalorder %v2077_v47, %v2353_v10 }
  0x69   : > { %v694_v8 = vadd.f32 %v678_v58, %v646_v7  ;;  %v884_v12 = vadd.f32 %v868_v50, %v852_v28  ;;  %v2636_v17 = vsel %vm555_vm5, %v801_v41, %v803_v1  ;;  %v2639_v2 = vsel %vm455_vm0, 1.0, %v3641_v30 }
  0x6a   : > { %v605_v6 = vadd.f32 %v589_v37, %v530_v4  ;;  %v835_v34 = vmul.f32 %v2636_v17, %v2338_v59  ;;  %v529_v58 = vmul.f32 %v2639_v2, %v2357_v11  ;;  %v545_v38 = vrot.slane %v2639_v2, 1 }
  0x6b   : > { %1032 = vmatpush1.msra.mxu1 %v694_v8  ;;  %v628_v50 = vmul.f32 %v2494_v63, %v2342_v23  ;;  %v924_v13 = vadd.f32 %v908_v24, %v884_v12  ;;  %v676_v1 = vmul.f32 %v2348_v31, %v2510_v51  ;;  %vm718_vm15 = vcmp.eq.s32.totalorder %v2080_v48, %v2168_v36 }
  0x6c   : > { %v645_v0 = vadd.f32 %v629_v18, %v605_v6  ;;  %v851_v4 = vadd.f32 %v835_v34, %v785_v16  ;;  %v2654_v7 = vsel %vm555_vm5, %v545_v38, %v547_v49  ;;  %v2657_v28 = vsel %vm718_vm15, 1.0, %v3641_v30 }
  0x6d   : > { %v866_v37 = vmul.f32 %v2513_v14, %v2165_v35  ;;  %959 = vmatprep.subr.mxu0 %v924_v13  ;;  %v588_v24 = vmul.f32 %v2338_v59, %v2654_v7  ;;  %v800_v51 = vrot.slane %v2657_v28, 1  ;;  %v906_v18 = vmul.f32 %v2530_v53, %v2141_v27 }
  0x6e   : > { %v693_v63 = vadd.f32 %v677_v43, %v645_v0  ;;  %v883_v8 = vadd.f32 %v867_v32, %v851_v4  ;;  %v784_v49 = vmul.f32 %v2657_v28, %v2218_v52  ;;  %vm454_vm6 = vcmp.eq.s32.totalorder %v2080_v48, %v2146_v29 }
  0x6f   : > { %v627_v14 = vmul.f32 %v2533_v19, %v2165_v35  ;;  %v604_v43 = vadd.f32 %v588_v24, %v529_v58  ;;  %v2674_v16 = vsel %vm555_vm5, %v800_v51, %v802_v40  ;;  %v2677_v12 = vsel %vm454_vm6, 1.0, %v3641_v30 }
  0x70   : > { %1033 = vmatprep.subr.mxu1 %v693_v63  ;;  %vm717_vm7 = vcmp.eq.s32.totalorder %v2080_v48, %v2369_v25  ;;  %v923_v53 = vadd.f32 %v907_v15, %v883_v8  ;;  %v834_v32 = vmul.f32 %v2674_v16, %v2190_v45  ;;  %v544_v6 = vrot.slane %v2677_v12, 1 }
  0x71   : > { %v675_v19 = vmul.f32 %v2141_v27, %v2551_v54  ;;  %v644_v34 = vadd.f32 %v628_v50, %v604_v43  ;;  %v528_v40 = vmul.f32 %v2677_v12, %v2218_v52  ;;  %v2689_v58 = vsel %vm717_vm7, 1.0, %v3641_v30 }
  0x72   : > { %v865_v13 = vmul.f32 %v2545_v26, %v2342_v23  ;;  %960 = vmatpush1.msra.mxu0 %v923_v53  ;;  %v850_v15 = vadd.f32 %v834_v32, %v784_v49  ;;  %v2695_v0 = vsel %vm555_vm5, %v544_v6, %v546_v55  ;;  %v799_v4 = vrot.slane %v2689_v58, 1 }
  0x73   : > { %v905_v54 = vmul.f32 %v2564_v21, %v2348_v31  ;;  %v692_v50 = vadd.f32 %v676_v1, %v644_v34  ;;  %v587_v63 = vmul.f32 %v2190_v45, %v2695_v0  ;;  %v783_v24 = vmul.f32 %v2689_v58, %v2357_v11 }
  0x74   : > { %vm453_vm9 = vcmp.eq.s32.totalorder %v2080_v48, %v2353_v10  ;;  %v882_v26 = vadd.f32 %v866_v37, %v850_v15  ;;  %v2708_v55 = vsel %vm555_vm5, %v799_v4, %v801_v41  ;;  %v626_v21 = vmul.f32 %v2567_v42, %v2342_v23 }
  0x75   : > { %v2711_v8 = vsel %vm453_vm9, 1.0, %v3641_v30  ;;  %1034 = vmatpush1.msra.mxu1 %v692_v50  ;;  %v603_v1 = vadd.f32 %v587_v63, %v528_v40  ;;  %v833_v49 = vmul.f32 %v2708_v55, %v2338_v59  ;;  %v674_v37 = vmul.f32 %v2348_v31, %v2584_v20 }
  0x76   : > { %v543_v43 = vrot.slane %v2711_v8, 1  ;;  %v922_v53 = vadd.f32 %v906_v18, %v882_v26  ;;  %v527_v41 = vmul.f32 %v2711_v8, %v2357_v11  ;;  %vm716_vm12 = vcmp.eq.s32.totalorder %v2085_v56, %v2168_v36 }
  0x77   : > { %v864_v42 = vmul.f32 %v2587_v22, %v2165_v35  ;;  %v643_v32 = vadd.f32 %v627_v14, %v603_v1  ;;  %v849_v34 = vadd.f32 %v833_v49, %v783_v24  ;;  %v2731_v15 = vsel %vm716_vm12, 1.0, %v3641_v30 }
  0x78   : > { %v2728_v40 = vsel %vm555_vm5, %v543_v43, %v545_v38  ;;  %961 = vmatprep.subr.mxu0 %v922_v53  ;;  %v798_v18 = vrot.slane %v2731_v15, 1  ;;  %v904_v50 = vmul.f32 %v2603_v61, %v2141_v27  ;;  %vm452_vm1 = vcmp.eq.s32.totalorder %v2085_v56, %v2146_v29 }
  0x79   : > { %v586_v20 = vmul.f32 %v2338_v59, %v2728_v40  ;;  %v691_v22 = vadd.f32 %v675_v19, %v643_v32  ;;  %v881_v14 = vadd.f32 %v865_v13, %v849_v34  ;;  %v782_v38 = vmul.f32 %v2731_v15, %v2218_v52 }
  0x7a   : > { %v2743_v63 = vsel %vm452_vm1, 1.0, %v3641_v30  ;;  %v2747_v26 = vsel %vm555_vm5, %v798_v18, %v800_v51  ;;  %v625_v61 = vmul.f32 %v2599_v57, %v2165_v35  ;;  %vm715_vm10 = vcmp.eq.s32.totalorder %v2085_v56, %v2369_v25 }
  0x7b   : > { %v602_v24 = vadd.f32 %v586_v20, %v527_v41  ;;  %v542_v1 = vrot.slane %v2743_v63, 1  ;;  %1035 = vmatprep.subr.mxu1 %v691_v22  ;;  %v921_v49 = vadd.f32 %v905_v54, %v881_v14  ;;  %v832_v19 = vmul.f32 %v2747_v26, %v2190_v45 }
  0x7c   : > { %v526_v13 = vmul.f32 %v2743_v63, %v2218_v52  ;;  %v673_v41 = vmul.f32 %v2141_v27, %v2616_v39  ;;  %v2765_v57 = vsel %vm715_vm10, 1.0, %v3641_v30  ;;  %v903_v39 = vmul.f32 %v2636_v17, %v2348_v31 }
  0x7d   : > { %v642_v53 = vadd.f32 %v626_v21, %v602_v24  ;;  %v2760_v51 = vsel %vm555_vm5, %v542_v1, %v544_v6  ;;  %962 = vmatpush1.msra.mxu0 %v921_v49  ;;  %v848_v54 = vadd.f32 %v832_v19, %v782_v38  ;;  %v797_v34 = vrot.slane %v2765_v57, 1 }
  0x7e   : > { %v585_v32 = vmul.f32 %v2190_v45, %v2760_v51  ;;  %v863_v21 = vmul.f32 %v2621_v9, %v2342_v23  ;;  %v781_v6 = vmul.f32 %v2765_v57, %v2357_v11  ;;  %vm451_vm2 = vcmp.eq.s32.totalorder %v2085_v56, %v2353_v10 }
  0x7f   : > { %v690_v20 = vadd.f32 %v674_v37, %v642_v53  ;;  %v880_v22 = vadd.f32 %v864_v42, %v848_v54  ;;  %v2780_v38 = vsel %vm555_vm5, %v797_v34, %v799_v4  ;;  %v2783_v24 = vsel %vm451_vm2, 1.0, %v3641_v30 }
  0x80   : > { %v601_v14 = vadd.f32 %v585_v32, %v526_v13  ;;  %v831_v9 = vmul.f32 %v2780_v38, %v2338_v59  ;;  %v525_v37 = vmul.f32 %v2783_v24, %v2357_v11  ;;  %v541_v17 = vrot.slane %v2783_v24, 1 }
  0x81   : > { %1036 = vmatpush1.msra.mxu1 %v690_v20  ;;  %v624_v42 = vmul.f32 %v2639_v2, %v2342_v23  ;;  %v920_v49 = vadd.f32 %v904_v50, %v880_v22  ;;  %v672_v4 = vmul.f32 %v2348_v31, %v2654_v7  ;;  %vm714_vm8 = vcmp.eq.s32.totalorder %v2088_v60, %v2168_v36 }
  0x82   : > { %v641_v19 = vadd.f32 %v625_v61, %v601_v14  ;;  %v847_v13 = vadd.f32 %v831_v9, %v781_v6  ;;  %v2798_v53 = vsel %vm555_vm5, %v541_v17, %v543_v43  ;;  %v1901_v54 = vsel %vm714_vm8, 1.0, %v3641_v30 }
  0x83   : > { %v862_v32 = vmul.f32 %v2657_v28, %v2165_v35  ;;  %963 = vmatprep.subr.mxu0 %v920_v49  ;;  %v584_v50 = vmul.f32 %v2338_v59, %v2798_v53  ;;  %v796_v61 = vrot.slane %v1901_v54, 1  ;;  %v902_v7 = vmul.f32 %v2674_v16, %v2141_v27 }
  0x84   : > { %v689_v2 = vadd.f32 %v673_v41, %v641_v19  ;;  %v879_v20 = vadd.f32 %v863_v21, %v847_v13  ;;  %v780_v6 = vmul.f32 %v1901_v54, %v2218_v52  ;;  %vm450_vm3 = vcmp.eq.s32.totalorder %v2088_v60, %v2146_v29 }
  0x85   : > { %v623_v43 = vmul.f32 %v2677_v12, %v2165_v35  ;;  %v600_v28 = vadd.f32 %v584_v50, %v525_v37  ;;  %v824_v41 = vsel %vm555_vm5, %v796_v61, %v798_v18  ;;  %v1877_v22 = vsel %vm450_vm3, 1.0, %v3641_v30 }
  0x86   : > { %1037 = vmatprep.subr.mxu1 %v689_v2  ;;  %vm713_vm11 = vcmp.eq.s32.totalorder %v2088_v60, %v2369_v25  ;;  %v919_v16 = vadd.f32 %v903_v39, %v879_v20  ;;  %v830_v21 = vmul.f32 %v824_v41, %v2190_v45  ;;  %v540_v14 = vrot.slane %v1877_v22, 1 }
  0x87   : > { %v671_v9 = vmul.f32 %v2141_v27, %v2695_v0  ;;  %v640_v49 = vadd.f32 %v624_v42, %v600_v28  ;;  %v524_v12 = vmul.f32 %v1877_v22, %v2218_v52  ;;  %v2822_v37 = vsel %vm713_vm11, 1.0, %v3641_v30 }
  0x88   : > { %v861_v18 = vmul.f32 %v2689_v58, %v2342_v23  ;;  %964 = vmatpush1.msra.mxu0 %v919_v16  ;;  %v846_v19 = vadd.f32 %v830_v21, %v780_v6  ;;  %v569_v39 = vsel %vm555_vm5, %v540_v14, %v542_v1  ;;  %v795_v13 = vrot.slane %v2822_v37, 1 }
  0x89   : > { %v901_v54 = vmul.f32 %v2708_v55, %v2348_v31  ;;  %v688_v0 = vadd.f32 %v672_v4, %v640_v49  ;;  %v583_v42 = vmul.f32 %v2190_v45, %v569_v39  ;;  %v779_v2 = vmul.f32 %v2822_v37, %v2357_v11 }
  0x8a   : > { %vm449_vm13 = vcmp.eq.s32.totalorder %v2088_v60, %v2353_v10  ;;  %v878_v58 = vadd.f32 %v862_v32, %v846_v19  ;;  %v823_v50 = vsel %vm555_vm5, %v795_v13, %v797_v34  ;;  %v622_v20 = vmul.f32 %v2711_v8, %v2342_v23 }
  0x8b   : > { %v2839_v1 = vsel %vm449_vm13, 1.0, %v3641_v30  ;;  %1038 = vmatpush1.msra.mxu1 %v688_v0  ;;  %v599_v55 = vadd.f32 %v583_v42, %v524_v12  ;;  %v829_v4 = vmul.f32 %v823_v50, %v2338_v59  ;;  %v670_v28 = vmul.f32 %v2348_v31, %v2728_v40 }
  0x8c   : > { %v539_v6 = vrot.slane %v2839_v1, 1  ;;  %v918_v41 = vadd.f32 %v902_v7, %v878_v58  ;;  %v523_v32 = vmul.f32 %v2839_v1, %v2357_v11  ;;  %vm712_vm14 = vcmp.eq.s32.totalorder %v2046_v3, %v2168_v36 }
  0x8d   : > { %v860_v34 = vmul.f32 %v2731_v15, %v2165_v35  ;;  %v639_v8 = vadd.f32 %v623_v43, %v599_v55  ;;  %v845_v22 = vadd.f32 %v829_v4, %v779_v2  ;;  %v1899_v21 = vsel %vm712_vm14, 1.0, %v3641_v30 }
  0x8e   : > { %v568_v16 = vsel %vm555_vm5, %v539_v6, %v541_v17  ;;  %965 = vmatprep.subr.mxu0 %v918_v41  ;;  %v794_v7 = vrot.slane %v1899_v21, 1  ;;  %v900_v49 = vmul.f32 %v2747_v26, %v2141_v27  ;;  %vm448_vm4 = vcmp.eq.s32.totalorder %v2046_v3, %v2146_v29 }
  0x8f   : > { %v582_v40 = vmul.f32 %v2338_v59, %v568_v16  ;;  %v687_v36 = vadd.f32 %v671_v9, %v639_v8  ;;  %v877_v12 = vadd.f32 %v861_v18, %v845_v22  ;;  %v778_v15 = vmul.f32 %v1899_v21, %v2218_v52  ;;  %v3646_v16 = vld [vmem:[#allocation14_spill] sm:$0xff] }
  0x90   : > { %v1875_v43 = vsel %vm448_vm4, 1.0, %v3641_v30  ;;  %v826_v17 = vsel %vm555_vm5, %v794_v7, %v796_v61  ;;  %v621_v39 = vmul.f32 %v2743_v63, %v2165_v35  ;;  %vm711_vm0 = vcmp.eq.s32.totalorder %v2046_v3, %v2369_v25  ;;  %v3650_v7 = vld [vmem:[#allocation5_spill] sm:$0xff] }
  0x91   : > { %v598_v37 = vadd.f32 %v582_v40, %v523_v32  ;;  %v538_v19 = vrot.slane %v1875_v43, 1  ;;  %1039 = vmatprep.subr.mxu1 %v687_v36  ;;  %v917_v0 = vadd.f32 %v901_v54, %v877_v12  ;;  %v828_v26 = vmul.f32 %v826_v17, %v2190_v45  ;;  %v1920_v17 = vld [vmem:[%s2909_s24 + $0x4] sm:$0x7] }
  0x92   : > { %v522_v29 = vmul.f32 %v1875_v43, %v2218_v52  ;;  %v669_v61 = vmul.f32 %v2141_v27, %v2760_v51  ;;  %v1898_v42 = vsel %vm711_vm0, 1.0, %v3641_v30  ;;  %v859_v58 = vmul.f32 %v2765_v57, %v2342_v23 }
  0x93   : > { %v638_v9 = vadd.f32 %v622_v20, %v598_v37  ;;  %v571_v18 = vsel %vm555_vm5, %v538_v19, %v540_v14  ;;  %966 = vmatpush1.msra.mxu0 %v917_v0  ;;  %v844_v63 = vadd.f32 %v828_v26, %v778_v15  ;;  %v793_v2 = vrot.slane %v1898_v42, 1 }
  0x94   : > { %v581_v54 = vmul.f32 %v2190_v45, %v571_v18  ;;  %v777_v25 = vmul.f32 %v1898_v42, %v2357_v11  ;;  %v899_v14 = vmul.f32 %v2780_v38, %v2348_v31  ;;  %vm447_vm15 = vcmp.eq.s32.totalorder %v2046_v3, %v2353_v10 }
  0x95   : > { %v686_v50 = vadd.f32 %v670_v28, %v638_v9  ;;  %vm933_vm6 = vcmask 523264   ;;  %v876_v51 = vadd.f32 %v860_v34, %v844_v63  ;;  %v825_v20 = vsel %vm555_vm5, %v793_v2, %v795_v13  ;;  %v700_v63 = vld [vmem:[%s2909_s24] sm:$0x7] }
  0x96   : > { %v597_v1 = vadd.f32 %v581_v54, %v522_v29  ;;  %v1874_v55 = vsel %vm447_vm15, 1.0, %v3641_v30  ;;  %v827_v57 = vmul.f32 %v825_v20, %v2338_v59  ;;  %v620_v38 = vmul.f32 %v2783_v24, %v2342_v23 }
  0x97   : > { %1040 = vmatpush1.msra.mxu1 %v686_v50  ;;  %v521_v4 = vmul.f32 %v1874_v55, %v2357_v11  ;;  %v537_v28 = vrot.slane %v1874_v55, 1  ;;  %v916_v41 = vadd.f32 %v900_v49, %v876_v51  ;;  %v668_v32 = vmul.f32 %v2348_v31, %v2798_v53  ;;  %v3648_v53 = vld [vmem:[#allocation3_spill] sm:$0xff] }
  0x98   : > { %v637_v10 = vadd.f32 %v621_v39, %v597_v1  ;;  %v2896_v13 = vrot.slane %v2158_v33, %v2050_v5  ;;  %v843_v34 = vadd.f32 %v827_v57, %v777_v25  ;;  %v2902_v22 = vrot.slane %v2327_v62, %v2050_v5  ;;  %v3647_v33 = vld [vmem:[#allocation2_spill] sm:$0xff] }
  0x99   : > { %v570_v8 = vsel %vm555_vm5, %v537_v28, %v539_v6  ;;  %v1923_v24 = vadd.s32 4294967168, %v3646_v16  ;;  %967 = vmatprep.subr.mxu0 %v916_v41  ;;  %v3649_v6 = vld [vmem:[#allocation4_spill] sm:$0xff] }
  0x9a   : > { %v685_v21 = vadd.f32 %v669_v61, %v637_v10  ;;  %v580_v40 = vmul.f32 %v2338_v59, %v570_v8  ;;  %vm1107_vm7 = vcmp.eq.s32.totalorder %v3647_v33, %v2896_v13  ;;  %vm1109_vm9 = vcmp.eq.s32.totalorder %v3648_v53, %v2896_v13 }
  0x9b   : > { %v875_v62 = vadd.f32 %v859_v58, %v843_v34  ;;  %vm1111_vm12 = vcmp.eq.s32.totalorder %v3649_v6, %v2896_v13  ;;  %vm1113_vm1 = vcmp.eq.s32.totalorder %v3650_v7, %v2896_v13  ;;  %v2920_v49 = vsel %vm1107_vm7, 1.0, %v3641_v30 }
  0x9c   : > { %1041 = vmatprep.subr.mxu1 %v685_v21  ;;  %v596_v36 = vadd.f32 %v580_v40, %v521_v4  ;;  %v2923_v12 = vsel %vm1109_vm9, 1.0, %v3641_v30  ;;  %v2926_v15 = vsel %vm1111_vm12, 1.0, %v3641_v30  ;;  %v1946_v43 = vsel %vm1113_vm1, 1.0, %v3641_v30 }
  0x9d   : > { %v915_v37 = vadd.f32 %v899_v14, %v875_v62  ;;  %v1173_v19 = vmul.f32 %v2920_v49, %v2218_v52  ;;  %v1189_v39 = vrot.slane %v2920_v49, 1  ;;  %v1191_v0 = vrot.slane %v2923_v12, 1 }
  0x9e   : > { %v636_v26 = vadd.f32 %v620_v38, %v596_v36  ;;  %v1255_v29 = vmul.f32 %v2926_v15, %v2165_v35  ;;  %v1273_v9 = vrot.slane %v2926_v15, 1  ;;  %v1275_v18 = vrot.slane %v1946_v43, 1 }
  0x9f   : > { %968 = vmatpush1.msra.mxu0 %v915_v37  ;;  %v2943_v61 = vsel %vm555_vm5, %v1189_v39, %v1191_v0  ;;  %vm1415_vm10 = vcmp.eq.s32.totalorder %v3647_v33, %v2902_v22  ;;  %vm1417_vm2 = vcmp.eq.s32.totalorder %v3648_v53, %v2902_v22  ;;  %vm1419_vm8 = vcmp.eq.s32.totalorder %v3649_v6, %v2902_v22 }
  0xa0   : > { %v684_v42 = vadd.f32 %v668_v32, %v636_v26  ;;  %1921 = vmatmul.mubr.msk.f32.vlgmr.msra.gmra.mxu0 %vm933_vm6, %v1920_v17  ;;  %v1223_v54 = vmul.f32 %v2943_v61, %v2190_v45  ;;  %v1277_v2 = vsel %vm555_vm5, %v1273_v9, %v1275_v18  ;;  %vm1421_vm3 = vcmp.eq.s32.totalorder %v3650_v7, %v2902_v22 }
  0xa1   : > { %v2962_v58 = vsel %vm1415_vm10, 1.0, %v3641_v30  ;;  %v2965_v50 = vsel %vm1417_vm2, 1.0, %v3641_v30  ;;  %v2968_v25 = vsel %vm1419_vm8, 1.0, %v3641_v30  ;;  %v1949_v14 = vadd.s32 4294967104, %v3646_v16  ;;  %1381 = vmatprep.mubr.f32.mxu0 %v3641_v30 }
  0xa2   : > { %1042 = vmatpush1.msra.mxu1 %v684_v42  ;;  %v1239_v51 = vadd.f32 %v1223_v54, %v1173_v19  ;;  %v1295_v1 = vmul.f32 %v1277_v2, %v2141_v27  ;;  %v1972_v20 = vsel %vm1421_vm3, 1.0, %v3641_v30  ;;  %v1497_v55 = vrot.slane %v2962_v58, 1 }
  0xa3   : > { %1922 = vmatmul.mubr.msk.f32.vlgmr.msra.gmra.mxu1 %vm933_vm6, %v700_v63  ;;  %v1499_v57 = vrot.slane %v2965_v50, 1  ;;  %v1581_v4 = vrot.slane %v2968_v25, 1  ;;  %v1583_v28 = vrot.slane %v1972_v20, 1  ;;  %v1481_v41 = vmul.f32 %v2962_v58, %v2218_v52 }
  0xa4   : > { %v1271_v38 = vadd.f32 %v1255_v29, %v1239_v51  ;;  %v1563_v10 = vmul.f32 %v2968_v25, %v2165_v35  ;;  %v2983_v32 = vrot.slane %v1923_v24, %v2050_v5  ;;  %1689 = vmatprep.mubr.f32.mxu1 %v3641_v30  ;;  %v2999_v16 = vrot.slane %v1949_v14, %v2050_v5 }
  0xa5   : > { %v2992_v34 = vsel %vm555_vm5, %v1497_v55, %v1499_v57  ;;  %v1585_v8 = vsel %vm555_vm5, %v1581_v4, %v1583_v28  ;;  %vm1105_vm11 = vcmp.eq.s32.totalorder %v2071_v44, %v2896_v13  ;;  %vm1413_vm1 = vcmp.eq.s32.totalorder %v2071_v44, %v2902_v22 }
  0xa6   : > { %v1311_v24 = vadd.f32 %v1295_v1, %v1271_v38  ;;  %v1531_v21 = vmul.f32 %v2992_v34, %v2190_v45  ;;  %v1603_v40 = vmul.f32 %v1585_v8, %v2141_v27  ;;  %vm1106_vm13 = vcmp.eq.s32.totalorder %v3647_v33, %v2983_v32 }
  0xa7   : > { %vm1108_vm14 = vcmp.eq.s32.totalorder %v3648_v53, %v2983_v32  ;;  %vm1110_vm4 = vcmp.eq.s32.totalorder %v3649_v6, %v2983_v32  ;;  %vm1112_vm0 = vcmp.eq.s32.totalorder %v3650_v7, %v2983_v32  ;;  %v3015_v62 = vsel %vm1106_vm13, 1.0, %v3641_v30 }
  0xa8   : > { %1333 = vmatprep.subr.mxu0 %v1311_v24  ;;  %v1547_v36 = vadd.f32 %v1531_v21, %v1481_v41  ;;  %v3018_v43 = vsel %vm1108_vm14, 1.0, %v3641_v30  ;;  %v3021_v37 = vsel %vm1110_vm4, 1.0, %v3641_v30  ;;  %v1945_v17 = vsel %vm1112_vm0, 1.0, %v3641_v30 }
  0xa9   : > { %v1172_v19 = vmul.f32 %v3015_v62, %v2357_v11  ;;  %v1188_v26 = vrot.slane %v3015_v62, 1  ;;  %v1190_v29 = vrot.slane %v3018_v43, 1  ;;  %v1254_v18 = vmul.f32 %v3021_v37, %v2342_v23 }
  0xaa   : > { %v1579_v42 = vadd.f32 %v1563_v10, %v1547_v36  ;;  %v1272_v63 = vrot.slane %v3021_v37, 1  ;;  %v1274_v54 = vrot.slane %v1945_v17, 1  ;;  %vm1414_vm15 = vcmp.eq.s32.totalorder %v3647_v33, %v2999_v16 }
  0xab   : > { %v3039_v2 = vsel %vm555_vm5, %v1188_v26, %v1190_v29  ;;  %vm1416_vm7 = vcmp.eq.s32.totalorder %v3648_v53, %v2999_v16  ;;  %vm1418_vm9 = vcmp.eq.s32.totalorder %v3649_v6, %v2999_v16  ;;  %vm1420_vm12 = vcmp.eq.s32.totalorder %v3650_v7, %v2999_v16 }
  0xac   : > { %v1619_v14 = vadd.f32 %v1603_v40, %v1579_v42  ;;  %v1222_v33 = vmul.f32 %v3039_v2, %v2338_v59  ;;  %v1276_v51 = vsel %vm555_vm5, %v1272_v63, %v1274_v54  ;;  %v3052_v1 = vsel %vm1414_vm15, 1.0, %v3641_v30 }
  0xad   : > { %v3055_v20 = vsel %vm1416_vm7, 1.0, %v3641_v30  ;;  %v1969_v53 = vsel %vm1418_vm9, 1.0, %v3641_v30  ;;  %v1971_v6 = vsel %vm1420_vm12, 1.0, %v3641_v30  ;;  %v3063_v7 = vsel %vm1105_vm11, 1.0, %v3641_v30 }
  0xae   : > { %1641 = vmatprep.subr.mxu1 %v1619_v14  ;;  %v1238_v28 = vadd.f32 %v1222_v33, %v1172_v19  ;;  %v1294_v38 = vmul.f32 %v1276_v51, %v2348_v31  ;;  %v1496_v41 = vrot.slane %v3052_v1, 1  ;;  %v1498_v10 = vrot.slane %v3055_v20, 1 }
  0xaf   : > { %v1480_v8 = vmul.f32 %v3052_v1, %v2357_v11  ;;  %v1562_v24 = vmul.f32 %v1969_v53, %v2342_v23  ;;  %v1580_v21 = vrot.slane %v1969_v53, 1  ;;  %v1582_v40 = vrot.slane %v1971_v6, 1 }
  0xb0   : > { %v1270_v36 = vadd.f32 %v1254_v18, %v1238_v28  ;;  %v3073_v37 = vsel %vm555_vm5, %v1496_v41, %v1498_v10  ;;  %v1171_v17 = vmul.f32 %v3063_v7, %v2218_v52  ;;  %v1187_v19 = vrot.slane %v3063_v7, 1 }
  0xb1   : > { %v1530_v42 = vmul.f32 %v3073_v37, %v2338_v59  ;;  %v1584_v54 = vsel %vm555_vm5, %v1580_v21, %v1582_v40  ;;  %v1279_v18 = vsel %vm555_vm5, %v1191_v0, %v1273_v9  ;;  %v1253_v51 = vmul.f32 %v2923_v12, %v2165_v35 }
  0xb2   : > { %v1310_v14 = vadd.f32 %v1294_v38, %v1270_v36  ;;  %v3094_v33 = vsel %vm555_vm5, %v1187_v19, %v1189_v39  ;;  %v3099_v15 = vsel %vm1413_vm1, 1.0, %v3641_v30  ;;  %v1602_v6 = vmul.f32 %v1584_v54, %v2348_v31 }
  0xb3   : > { %v1546_v53 = vadd.f32 %v1530_v42, %v1480_v8  ;;  %v1221_v0 = vmul.f32 %v3094_v33, %v2190_v45  ;;  %v1495_v9 = vrot.slane %v3099_v15, 1  ;;  %v1293_v28 = vmul.f32 %v1279_v18, %v2141_v27 }
  0xb4   : > { %1334 = vmatpush1.msra.mxu0 %v1310_v14  ;;  %v1479_v39 = vmul.f32 %v3099_v15, %v2218_v52  ;;  %v1587_v12 = vsel %vm555_vm5, %v1499_v57, %v1581_v4  ;;  %vm1104_vm10 = vcmp.eq.s32.totalorder %v2071_v44, %v2983_v32  ;;  %v1561_v36 = vmul.f32 %v2965_v50, %v2165_v35 }
  0xb5   : > { %v1578_v38 = vadd.f32 %v1562_v24, %v1546_v53  ;;  %v1237_v8 = vadd.f32 %v1221_v0, %v1171_v17  ;;  %v3120_v40 = vsel %vm555_vm5, %v1495_v9, %v1497_v55  ;;  %v3127_v42 = vsel %vm1104_vm10, 1.0, %v3641_v30 }
  0xb6   : > { %v1529_v25 = vmul.f32 %v3120_v40, %v2190_v45  ;;  %v1252_v57 = vmul.f32 %v3018_v43, %v2342_v23  ;;  %vm1412_vm2 = vcmp.eq.s32.totalorder %v2071_v44, %v2999_v16  ;;  %v1601_v55 = vmul.f32 %v1587_v12, %v2141_v27 }
  0xb7   : > { %v1618_v4 = vadd.f32 %v1602_v6, %v1578_v38  ;;  %v1269_v24 = vadd.f32 %v1253_v51, %v1237_v8  ;;  %v1186_v17 = vrot.slane %v3127_v42, 1  ;;  %v1170_v50 = vmul.f32 %v3127_v42, %v2357_v11 }
  0xb8   : > { %v1545_v54 = vadd.f32 %v1529_v25, %v1479_v39  ;;  %v1278_v18 = vsel %vm555_vm5, %v1190_v29, %v1272_v63  ;;  %v3142_v14 = vsel %vm1412_vm2, 1.0, %v3641_v30  ;;  %v1586_v63 = vsel %vm555_vm5, %v1498_v10, %v1580_v21 }
  0xb9   : > { %1642 = vmatpush1.msra.mxu1 %v1618_v4  ;;  %v1309_v44 = vadd.f32 %v1293_v28, %v1269_v24  ;;  %v3148_v51 = vsel %vm555_vm5, %v1186_v17, %v1188_v26  ;;  %v1478_v53 = vmul.f32 %v3142_v14, %v2357_v11  ;;  %v1494_v6 = vrot.slane %v3142_v14, 1 }
  0xba   : > { %v1577_v43 = vadd.f32 %v1561_v36, %v1545_v54  ;;  %v1220_v29 = vmul.f32 %v3148_v51, %v2338_v59  ;;  %vm1103_vm8 = vcmp.eq.s32.totalorder %v2074_v46, %v2896_v13  ;;  %v1292_v0 = vmul.f32 %v1278_v18, %v2348_v31 }
  0xbb   : > { %1335 = vmatprep.subr.mxu0 %v1309_v44  ;;  %v3162_v26 = vsel %vm555_vm5, %v1494_v6, %v1496_v41  ;;  %v3165_v28 = vsel %vm1103_vm8, 1.0, %v3641_v30  ;;  %v1560_v10 = vmul.f32 %v3055_v20, %v2342_v23  ;;  %v1600_v21 = vmul.f32 %v1586_v63, %v2348_v31 }
  0xbc   : > { %v1617_v39 = vadd.f32 %v1601_v55, %v1577_v43  ;;  %v1236_v12 = vadd.f32 %v1220_v29, %v1170_v50  ;;  %v1528_v38 = vmul.f32 %v3162_v26, %v2338_v59  ;;  %v1185_v8 = vrot.slane %v3165_v28, 1 }
  0xbd   : > { %v1251_v36 = vmul.f32 %v2920_v49, %v2165_v35  ;;  %vm1411_vm3 = vcmp.eq.s32.totalorder %v2074_v46, %v2902_v22  ;;  %v1169_v4 = vmul.f32 %v3165_v28, %v2218_v52  ;;  %vm1102_vm11 = vcmp.eq.s32.totalorder %v2074_v46, %v2983_v32 }
  0xbe   : > { %1643 = vmatprep.subr.mxu1 %v1617_v39  ;;  %v1268_v41 = vadd.f32 %v1252_v57, %v1236_v12  ;;  %v1544_v25 = vadd.f32 %v1528_v38, %v1478_v53  ;;  %v3180_v24 = vsel %vm1411_vm3, 1.0, %v3641_v30  ;;  %v3184_v20 = vsel %vm555_vm5, %v1185_v8, %v1187_v19 }
  0xbf   : > { %v1477_v55 = vmul.f32 %v3180_v24, %v2218_v52  ;;  %v1493_v49 = vrot.slane %v3180_v24, 1  ;;  %v1219_v50 = vmul.f32 %v3184_v20, %v2190_v45  ;;  %v3194_v18 = vsel %vm1102_vm11, 1.0, %v3641_v30 }
  0xc0   : > { %v1308_v57 = vadd.f32 %v1292_v0, %v1268_v41  ;;  %v1576_v54 = vadd.f32 %v1560_v10, %v1544_v25  ;;  %v1291_v19 = vmul.f32 %v2943_v61, %v2141_v27  ;;  %v1559_v53 = vmul.f32 %v2962_v58, %v2165_v35 }
  0xc1   : > { %v3200_v44 = vsel %vm555_vm5, %v1493_v49, %v1495_v9  ;;  %v1184_v43 = vrot.slane %v3194_v18, 1  ;;  %v1235_v63 = vadd.f32 %v1219_v50, %v1169_v4  ;;  %v1168_v39 = vmul.f32 %v3194_v18, %v2357_v11 }
  0xc2   : > { %1336 = vmatpush1.msra.mxu0 %v1308_v57  ;;  %v1616_v29 = vadd.f32 %v1600_v21, %v1576_v54  ;;  %v1527_v0 = vmul.f32 %v3200_v44, %v2190_v45  ;;  %v1599_v61 = vmul.f32 %v2992_v34, %v2141_v27  ;;  %v1250_v58 = vmul.f32 %v3015_v62, %v2342_v23 }
  0xc3   : > { %v3213_v9 = vsel %vm555_vm5, %v1184_v43, %v1186_v17  ;;  %vm1410_vm13 = vcmp.eq.s32.totalorder %v2074_v46, %v2999_v16  ;;  %v1267_v12 = vadd.f32 %v1251_v36, %v1235_v63  ;;  %v1290_v34 = vmul.f32 %v3039_v2, %v2348_v31 }
  0xc4   : > { %1644 = vmatpush1.msra.mxu1 %v1616_v29  ;;  %v1543_v38 = vadd.f32 %v1527_v0, %v1477_v55  ;;  %v1218_v10 = vmul.f32 %v3213_v9, %v2338_v59  ;;  %v3222_v21 = vsel %vm1410_vm13, 1.0, %v3641_v30  ;;  %vm1101_vm14 = vcmp.eq.s32.totalorder %v2077_v47, %v2896_v13 }
  0xc5   : > { %v1476_v17 = vmul.f32 %v3222_v21, %v2357_v11  ;;  %v1492_v62 = vrot.slane %v3222_v21, 1  ;;  %v1307_v46 = vadd.f32 %v1291_v19, %v1267_v12  ;;  %v3232_v25 = vsel %vm1101_vm14, 1.0, %v3641_v30 }
  0xc6   : > { %v1575_v36 = vadd.f32 %v1559_v53, %v1543_v38  ;;  %v1234_v41 = vadd.f32 %v1218_v10, %v1168_v39  ;;  %v1558_v2 = vmul.f32 %v3052_v1, %v2342_v23  ;;  %v1167_v55 = vmul.f32 %v3232_v25, %v2218_v52 }
  0xc7   : > { %v3236_v4 = vsel %vm555_vm5, %v1492_v62, %v1494_v6  ;;  %v1183_v57 = vrot.slane %v3232_v25, 1  ;;  %1337 = vmatprep.subr.mxu0 %v1307_v46  ;;  %vm1409_vm4 = vcmp.eq.s32.totalorder %v2077_v47, %v2902_v22  ;;  %v1598_v6 = vmul.f32 %v3073_v37, %v2348_v31 }
  0xc8   : > { %v1615_v54 = vadd.f32 %v1599_v61, %v1575_v36  ;;  %v1266_v50 = vadd.f32 %v1250_v58, %v1234_v41  ;;  %v1526_v19 = vmul.f32 %v3236_v4, %v2338_v59  ;;  %v1249_v53 = vmul.f32 %v3063_v7, %v2165_v35 }
  0xc9   : > { %v3251_v1 = vsel %vm555_vm5, %v1183_v57, %v1185_v8  ;;  %v3256_v29 = vsel %vm1409_vm4, 1.0, %v3641_v30  ;;  %v1289_v61 = vmul.f32 %v3094_v33, %v2141_v27  ;;  %v1557_v7 = vmul.f32 %v3099_v15, %v2165_v35 }
  0xca   : > { %1645 = vmatprep.subr.mxu1 %v1615_v54  ;;  %v1306_v63 = vadd.f32 %v1290_v34, %v1266_v50  ;;  %v1542_v0 = vadd.f32 %v1526_v19, %v1476_v17  ;;  %v1217_v39 = vmul.f32 %v3251_v1, %v2190_v45  ;;  %v1475_v37 = vmul.f32 %v3256_v29, %v2218_v52 }
  0xcb   : > { %v1491_v8 = vrot.slane %v3256_v29, 1  ;;  %vm1100_vm0 = vcmp.eq.s32.totalorder %v2077_v47, %v2983_v32  ;;  %vm1408_vm15 = vcmp.eq.s32.totalorder %v2077_v47, %v2999_v16  ;;  %v1597_v10 = vmul.f32 %v3120_v40, %v2141_v27 }
  0xcc   : > { %1338 = vmatpush1.msra.mxu0 %v1306_v63  ;;  %v1574_v58 = vadd.f32 %v1558_v2, %v1542_v0  ;;  %v1233_v12 = vadd.f32 %v1217_v39, %v1167_v55  ;;  %v3270_v38 = vsel %vm1100_vm0, 1.0, %v3641_v30  ;;  %v3282_v34 = vsel %vm1408_vm15, 1.0, %v3641_v30 }
  0xcd   : > { %v3276_v33 = vsel %vm555_vm5, %v1491_v8, %v1493_v49  ;;  %v1182_v15 = vrot.slane %v3270_v38, 1  ;;  %v1166_v47 = vmul.f32 %v3270_v38, %v2357_v11  ;;  %v1248_v40 = vmul.f32 %v3127_v42, %v2342_v23 }
  0xce   : > { %v1614_v17 = vadd.f32 %v1598_v6, %v1574_v58  ;;  %v1265_v46 = vadd.f32 %v1249_v53, %v1233_v12  ;;  %v1525_v36 = vmul.f32 %v3276_v33, %v2190_v45  ;;  %v1474_v41 = vmul.f32 %v3282_v34, %v2357_v11 }
  0xcf   : > { %v3290_v49 = vsel %vm555_vm5, %v1182_v15, %v1184_v43  ;;  %v1490_v2 = vrot.slane %v3282_v34, 1  ;;  %vm1099_vm7 = vcmp.eq.s32.totalorder %v2080_v48, %v2896_v13  ;;  %v1288_v43 = vmul.f32 %v3148_v51, %v2348_v31 }
  0xd0   : > { %1646 = vmatpush1.msra.mxu1 %v1614_v17  ;;  %v1305_v55 = vadd.f32 %v1289_v61, %v1265_v46  ;;  %v1541_v54 = vadd.f32 %v1525_v36, %v1475_v37  ;;  %v1216_v50 = vmul.f32 %v3290_v49, %v2338_v59  ;;  %v1556_v19 = vmul.f32 %v3142_v14, %v2342_v23 }
  0xd1   : > { %v3305_v42 = vsel %vm555_vm5, %v1490_v2, %v1492_v62  ;;  %v3310_v6 = vsel %vm1099_vm7, 1.0, %v3641_v30  ;;  %v1596_v39 = vmul.f32 %v3162_v26, %v2348_v31  ;;  %v1247_v14 = vmul.f32 %v3165_v28, %v2165_v35 }
  0xd2   : > { %1339 = vmatprep.subr.mxu0 %v1305_v55  ;;  %v1573_v53 = vadd.f32 %v1557_v7, %v1541_v54  ;;  %v1232_v63 = vadd.f32 %v1216_v50, %v1166_v47  ;;  %v1524_v0 = vmul.f32 %v3305_v42, %v2338_v59  ;;  %v1165_v51 = vmul.f32 %v3310_v6, %v2218_v52 }
  0xd3   : > { %v1181_v62 = vrot.slane %v3310_v6, 1  ;;  %vm1407_vm9 = vcmp.eq.s32.totalorder %v2080_v48, %v2902_v22  ;;  %vm1098_vm12 = vcmp.eq.s32.totalorder %v2080_v48, %v2983_v32  ;;  %vm1406_vm1 = vcmp.eq.s32.totalorder %v2080_v48, %v2999_v16 }
  0xd4   : > { %v1613_v61 = vadd.f32 %v1597_v10, %v1573_v53  ;;  %v1264_v37 = vadd.f32 %v1248_v40, %v1232_v63  ;;  %v1540_v7 = vadd.f32 %v1524_v0, %v1474_v41  ;;  %v3324_v58 = vsel %vm1407_vm9, 1.0, %v3641_v30 }
  0xd5   : > { %v3328_v26 = vsel %vm555_vm5, %v1181_v62, %v1183_v57  ;;  %v1473_v12 = vmul.f32 %v3324_v58, %v2218_v52  ;;  %v1489_v17 = vrot.slane %v3324_v58, 1  ;;  %v3338_v36 = vsel %vm1098_vm12, 1.0, %v3641_v30 }
  0xd6   : > { %1647 = vmatprep.subr.mxu1 %v1613_v61  ;;  %v1304_v28 = vadd.f32 %v1288_v43, %v1264_v37  ;;  %v1572_v10 = vadd.f32 %v1556_v19, %v1540_v7  ;;  %v1215_v46 = vmul.f32 %v3328_v26, %v2190_v45  ;;  %v1287_v57 = vmul.f32 %v3184_v20, %v2141_v27 }
  0xd7   : > { %v3344_v47 = vsel %vm555_vm5, %v1489_v17, %v1491_v8  ;;  %v1555_v40 = vmul.f32 %v3180_v24, %v2165_v35  ;;  %v1180_v41 = vrot.slane %v3338_v36, 1  ;;  %v1164_v43 = vmul.f32 %v3338_v36, %v2357_v11 }
  0xd8   : > { %1340 = vmatpush1.msra.mxu0 %v1304_v28  ;;  %v1612_v55 = vadd.f32 %v1596_v39, %v1572_v10  ;;  %v1231_v54 = vadd.f32 %v1215_v46, %v1165_v51  ;;  %v1523_v50 = vmul.f32 %v3344_v47, %v2190_v45  ;;  %v1595_v20 = vmul.f32 %v3200_v44, %v2141_v27 }
  0xd9   : > { %v3357_v8 = vsel %vm555_vm5, %v1180_v41, %v1182_v15  ;;  %v1246_v24 = vmul.f32 %v3194_v18, %v2342_v23  ;;  %v3366_v0 = vsel %vm1406_vm1, 1.0, %v3641_v30  ;;  %v1286_v44 = vmul.f32 %v3213_v9, %v2348_v31 }
  0xda   : > { %1648 = vmatpush1.msra.mxu1 %v1612_v55  ;;  %v1263_v19 = vadd.f32 %v1247_v14, %v1231_v54  ;;  %v1539_v53 = vadd.f32 %v1523_v50, %v1473_v12  ;;  %v1214_v63 = vmul.f32 %v3357_v8, %v2338_v59  ;;  %v1472_v15 = vmul.f32 %v3366_v0, %v2357_v11 }
  0xdb   : > { %v1488_v18 = vrot.slane %v3366_v0, 1  ;;  %vm1097_vm10 = vcmp.eq.s32.totalorder %v2085_v56, %v2896_v13  ;;  %v1554_v9 = vmul.f32 %v3222_v21, %v2342_v23  ;;  %vm1405_vm2 = vcmp.eq.s32.totalorder %v2085_v56, %v2902_v22 }
  0xdc   : > { %v1303_v48 = vadd.f32 %v1287_v57, %v1263_v19  ;;  %v1571_v39 = vadd.f32 %v1555_v40, %v1539_v53  ;;  %v1230_v51 = vadd.f32 %v1214_v63, %v1164_v43  ;;  %v3376_v14 = vsel %vm1097_vm10, 1.0, %v3641_v30 }
  0xdd   : > { %v3380_v61 = vsel %vm555_vm5, %v1488_v18, %v1490_v2  ;;  %v1163_v37 = vmul.f32 %v3376_v14, %v2218_v52  ;;  %v1179_v7 = vrot.slane %v3376_v14, 1  ;;  %v1594_v2 = vmul.f32 %v3236_v4, %v2348_v31 }
  0xde   : > { %1341 = vmatprep.subr.mxu0 %v1303_v48  ;;  %v1611_v12 = vadd.f32 %v1595_v20, %v1571_v39  ;;  %v1262_v28 = vadd.f32 %v1246_v24, %v1230_v51  ;;  %v1522_v10 = vmul.f32 %v3380_v61, %v2338_v59  ;;  %v1245_v46 = vmul.f32 %v3232_v25, %v2165_v35 }
  0xdf   : > { %v3395_v21 = vsel %vm555_vm5, %v1179_v7, %v1181_v62  ;;  %v3400_v57 = vsel %vm1405_vm2, 1.0, %v3641_v30  ;;  %v1285_v50 = vmul.f32 %v3251_v1, %v2141_v27  ;;  %v1553_v25 = vmul.f32 %v3256_v29, %v2165_v35 }
  0xe0   : > { %1649 = vmatprep.subr.mxu1 %v1611_v12  ;;  %v1302_v40 = vadd.f32 %v1286_v44, %v1262_v28  ;;  %v1538_v55 = vadd.f32 %v1522_v10, %v1472_v15  ;;  %v1213_v54 = vmul.f32 %v3395_v21, %v2190_v45  ;;  %v1471_v4 = vmul.f32 %v3400_v57, %v2218_v52 }
  0xe1   : > { %v1487_v62 = vrot.slane %v3400_v57, 1  ;;  %vm1096_vm8 = vcmp.eq.s32.totalorder %v2085_v56, %v2983_v32  ;;  %vm1404_vm3 = vcmp.eq.s32.totalorder %v2085_v56, %v2999_v16  ;;  %v1593_v19 = vmul.f32 %v3276_v33, %v2141_v27 }
  0xe2   : > { %1342 = vmatpush1.msra.mxu0 %v1302_v40  ;;  %v1570_v43 = vadd.f32 %v1554_v9, %v1538_v55  ;;  %v1229_v20 = vadd.f32 %v1213_v54, %v1163_v37  ;;  %v3414_v24 = vsel %vm1096_vm8, 1.0, %v3641_v30  ;;  %v3426_v53 = vsel %vm1404_vm3, 1.0, %v3641_v30 }
  0xe3   : > { %v3420_v1 = vsel %vm555_vm5, %v1487_v62, %v1489_v17  ;;  %v1178_v29 = vrot.slane %v3414_v24, 1  ;;  %v1162_v56 = vmul.f32 %v3414_v24, %v2357_v11  ;;  %v1244_v33 = vmul.f32 %v3270_v38, %v2342_v23 }
  0xe4   : > { %v1610_v63 = vadd.f32 %v1594_v2, %v1570_v43  ;;  %v1261_v44 = vadd.f32 %v1245_v46, %v1229_v20  ;;  %v1521_v15 = vmul.f32 %v3420_v1, %v2190_v45  ;;  %v1470_v48 = vmul.f32 %v3426_v53, %v2357_v11 }
  0xe5   : > { %v3434_v17 = vsel %vm555_vm5, %v1178_v29, %v1180_v41  ;;  %v1486_v39 = vrot.slane %v3426_v53, 1  ;;  %vm1095_vm11 = vcmp.eq.s32.totalorder %v2088_v60, %v2896_v13  ;;  %v1284_v41 = vmul.f32 %v3290_v49, %v2348_v31 }
  0xe6   : > { %1650 = vmatpush1.msra.mxu1 %v1610_v63  ;;  %v1301_v51 = vadd.f32 %v1285_v50, %v1261_v44  ;;  %v1537_v9 = vadd.f32 %v1521_v15, %v1471_v4  ;;  %v1212_v37 = vmul.f32 %v3434_v17, %v2338_v59  ;;  %v1552_v12 = vmul.f32 %v3282_v34, %v2342_v23 }
  0xe7   : > { %v3449_v38 = vsel %vm555_vm5, %v1486_v39, %v1488_v18  ;;  %v1928_v28 = vsel %vm1095_vm11, 1.0, %v3641_v30  ;;  %v1592_v40 = vmul.f32 %v3305_v42, %v2348_v31  ;;  %v1243_v18 = vmul.f32 %v3310_v6, %v2165_v35 }
  0xe8   : > { %1343 = vmatprep.subr.mxu0 %v1301_v51  ;;  %v1569_v10 = vadd.f32 %v1553_v25, %v1537_v9  ;;  %v1228_v2 = vadd.f32 %v1212_v37, %v1162_v56  ;;  %v1520_v46 = vmul.f32 %v3449_v38, %v2338_v59  ;;  %v1161_v49 = vmul.f32 %v1928_v28, %v2218_v52 }
  0xe9   : > { %v1177_v55 = vrot.slane %v1928_v28, 1  ;;  %vm1403_vm13 = vcmp.eq.s32.totalorder %v2088_v60, %v2902_v22  ;;  %vm1094_vm14 = vcmp.eq.s32.totalorder %v2088_v60, %v2983_v32  ;;  %v1283_v44 = vmul.f32 %v3328_v26, %v2141_v27 }
  0xea   : > { %v1609_v34 = vadd.f32 %v1593_v19, %v1569_v10  ;;  %v1260_v54 = vadd.f32 %v1244_v33, %v1228_v2  ;;  %v1536_v50 = vadd.f32 %v1520_v46, %v1470_v48  ;;  %v3464_v4 = vsel %vm1403_vm13, 1.0, %v3641_v30 }
  0xeb   : > { %v1205_v25 = vsel %vm555_vm5, %v1177_v55, %v1179_v7  ;;  %v1469_v42 = vmul.f32 %v3464_v4, %v2218_v52  ;;  %v1485_v43 = vrot.slane %v3464_v4, 1  ;;  %v3475_v63 = vsel %vm1094_vm14, 1.0, %v3641_v30 }
  0xec   : > { %1651 = vmatprep.subr.mxu1 %v1609_v34  ;;  %v1300_v6 = vadd.f32 %v1284_v41, %v1260_v54  ;;  %v1568_v20 = vadd.f32 %v1552_v12, %v1536_v50  ;;  %v1211_v19 = vmul.f32 %v1205_v25, %v2190_v45  ;;  %v1551_v15 = vmul.f32 %v3324_v58, %v2165_v35 }
  0xed   : > { %v1513_v7 = vsel %vm555_vm5, %v1485_v43, %v1487_v62  ;;  %v1176_v56 = vrot.slane %v3475_v63, 1  ;;  %v1160_v9 = vmul.f32 %v3475_v63, %v2357_v11  ;;  %v1591_v37 = vmul.f32 %v3344_v47, %v2141_v27 }
  0xee   : > { %1344 = vmatpush1.msra.mxu0 %v1300_v6  ;;  %v1608_v33 = vadd.f32 %v1592_v40, %v1568_v20  ;;  %v1227_v48 = vadd.f32 %v1211_v19, %v1161_v49  ;;  %v1519_v51 = vmul.f32 %v1513_v7, %v2190_v45  ;;  %v1242_v62 = vmul.f32 %v3338_v36, %v2342_v23 }
  0xef   : > { %v1204_v26 = vsel %vm555_vm5, %v1176_v56, %v1178_v29  ;;  %vm1402_vm4 = vcmp.eq.s32.totalorder %v2088_v60, %v2999_v16  ;;  %v1282_v10 = vmul.f32 %v3357_v8, %v2348_v31  ;;  %vm1093_vm0 = vcmp.eq.s32.totalorder %v2046_v3, %v2896_v13 }
  0xf0   : > { %1652 = vmatpush1.msra.mxu1 %v1608_v33  ;;  %v1259_v58 = vadd.f32 %v1243_v18, %v1227_v48  ;;  %v1535_v41 = vadd.f32 %v1519_v51, %v1469_v42  ;;  %v1210_v12 = vmul.f32 %v1204_v26, %v2338_v59  ;;  %v1953_v28 = vsel %vm1402_vm4, 1.0, %v3641_v30 }
  0xf1   : > { %v1468_v47 = vmul.f32 %v1953_v28, %v2357_v11  ;;  %v1484_v2 = vrot.slane %v1953_v28, 1  ;;  %v1926_v60 = vsel %vm1093_vm0, 1.0, %v3641_v30  ;;  %v1550_v49 = vmul.f32 %v3366_v0, %v2342_v23 }
  0xf2   : > { %v1299_v36 = vadd.f32 %v1283_v44, %v1259_v58  ;;  %v1567_v29 = vadd.f32 %v1551_v15, %v1535_v41  ;;  %v1226_v46 = vadd.f32 %v1210_v12, %v1160_v9  ;;  %v1159_v18 = vmul.f32 %v1926_v60, %v2218_v52 }
  0xf3   : > { %v1512_v40 = vsel %vm555_vm5, %v1484_v2, %v1486_v39  ;;  %v1175_v8 = vrot.slane %v1926_v60, 1  ;;  %vm1401_vm15 = vcmp.eq.s32.totalorder %v2046_v3, %v2902_v22  ;;  %v1590_v13 = vmul.f32 %v3380_v61, %v2348_v31  ;;  %v3657_v60 = vld [vmem:[#allocation13_spill] sm:$0xff] }
  0xf4   : > { %1345 = vmatprep.subr.mxu0 %v1299_v36  ;;  %v1607_v34 = vadd.f32 %v1591_v37, %v1567_v29  ;;  %v1258_v54 = vadd.f32 %v1242_v62, %v1226_v46  ;;  %v1518_v50 = vmul.f32 %v1512_v40, %v2338_v59  ;;  %v1952_v4 = vsel %vm1401_vm15, 1.0, %v3641_v30  ;;  %v3656_v29 = vld [vmem:[#allocation8_spill] sm:$0xff] }
  0xf5   : > { %v1207_v39 = vsel %vm555_vm5, %v1175_v8, %v1177_v55  ;;  %v1241_v6 = vmul.f32 %v3376_v14, %v2165_v35  ;;  %v1281_v20 = vmul.f32 %v3395_v21, %v2141_v27  ;;  %v1467_v22 = vmul.f32 %v1952_v4, %v2218_v52 }
  0xf6   : > { %1653 = vmatprep.subr.mxu1 %v1607_v34  ;;  %v1298_v0 = vadd.f32 %v1282_v10, %v1258_v54  ;;  %v1534_v25 = vadd.f32 %v1518_v50, %v1468_v47  ;;  %v1209_v42 = vmul.f32 %v1207_v39, %v2190_v45  ;;  %v1483_v19 = vrot.slane %v1952_v4, 1  ;;  %v1973_v10 = vld [vmem:[%s2909_s24 + $0xc] sm:$0x7]  ;;  %v3653_v47 = vld [vmem:[#allocation6_spill] sm:$0xff] }
  0xf7   : > { %vm1092_vm7 = vcmp.eq.s32.totalorder %v2046_v3, %v2983_v32  ;;  %vm1400_vm9 = vcmp.eq.s32.totalorder %v2046_v3, %v2999_v16  ;;  %v1549_v21 = vmul.f32 %v3400_v57, %v2165_v35  ;;  %v1589_v48 = vmul.f32 %v3420_v1, %v2141_v27  ;;  %v1947_v3 = vld [vmem:[%s2909_s24 + $0x8] sm:$0x7] }
  0xf8   : > { %1346 = vmatpush1.msra.mxu0 %v1298_v0  ;;  %v1566_v61 = vadd.f32 %v1550_v49, %v1534_v25  ;;  %v1225_v55 = vadd.f32 %v1209_v42, %v1159_v18  ;;  %v1925_v63 = vsel %vm1092_vm7, 1.0, %v3641_v30  ;;  %v1515_v14 = vsel %vm555_vm5, %v1483_v19, %v1485_v43  ;;  %v3658_v49 = vld [vmem:[#allocation9_spill] sm:$0xff]  ;;  %v1708_v42 = vld [vmem:[%s233_s28] sm:$0x77] }
  0xf9   : > { %v1174_v44 = vrot.slane %v1925_v63, 1  ;;  %v1951_v52 = vsel %vm1400_vm9, 1.0, %v3641_v30  ;;  %v1517_v32 = vmul.f32 %v1515_v14, %v2190_v45  ;;  %v1158_v33 = vmul.f32 %v1925_v63, %v2357_v11 }
  0xfa   : > { %v1606_v7 = vadd.f32 %v1590_v13, %v1566_v61  ;;  %v1257_v15 = vadd.f32 %v1241_v6, %v1225_v55  ;;  %v1240_v43 = vmul.f32 %v3414_v24, %v2342_v23  ;;  %v1482_v51 = vrot.slane %v1951_v52, 1 }
  0xfb   : > { %v1206_v16 = vsel %vm555_vm5, %v1174_v44, %v1176_v56  ;;  %v1533_v57 = vadd.f32 %v1517_v32, %v1467_v22  ;;  %v1466_v45 = vmul.f32 %v1951_v52, %v2357_v11  ;;  %v1280_v37 = vmul.f32 %v3434_v17, %v2348_v31 }
  0xfc   : > { %1654 = vmatpush1.msra.mxu1 %v1606_v7  ;;  %v1297_v35 = vadd.f32 %v1281_v20, %v1257_v15  ;;  %v1208_v9 = vmul.f32 %v1206_v16, %v2338_v59  ;;  %v1514_v27 = vsel %vm555_vm5, %v1482_v51, %v1484_v2  ;;  %v1548_v26 = vmul.f32 %v3426_v53, %v2342_v23  ;;  %v3652_v23 = vld [vmem:[#allocation11_spill] sm:$0xff] }
  0xfd   : > { %v1565_v1 = vadd.f32 %v1549_v21, %v1533_v57  ;;  %v1516_v24 = vmul.f32 %v1514_v27, %v2338_v59  ;;  %v1588_v11 = vmul.f32 %v3449_v38, %v2348_v31  ;;  %v3651_v59 = vld [vmem:[#allocation10_spill] sm:$0xff]  ;;  %v3654_v2 = vld [vmem:[#allocation7_spill] sm:$0xff]  ;;  %v3655_v31 = vld [vmem:[#allocation12_spill] sm:$0xff]  ;;  %vm1740_vm1 = vcmask 0  }
  0xfe   : > { %1347 = vmatprep.subr.mxu0 %v1297_v35  ;;  %v1224_v56 = vadd.f32 %v1208_v9, %v1158_v33  ;;  %v409_v53 = vadd.f32 %v3652_v23, %v3651_v59  ;;  %v410_v36 = vadd.f32 %v3654_v2, %v3653_v47 }
  0xff   : > { %v1605_v62 = vadd.f32 %v1589_v48, %v1565_v1  ;;  %v1532_v41 = vadd.f32 %v1516_v24, %v1466_v45 }
 0x100   : > { %v1256_v58 = vadd.f32 %v1240_v43, %v1224_v56  ;;  %v411_v38 = vadd.f32 %v409_v53, %v3655_v31  ;;  %v412_v46 = vadd.f32 %v410_v36, %v3656_v29 }
 0x101   : > { %1655 = vmatprep.subr.mxu1 %v1605_v62  ;;  %v1564_v12 = vadd.f32 %v1548_v26, %v1532_v41 }
 0x102   : > { %v1296_v17 = vadd.f32 %v1280_v37, %v1256_v58  ;;  %v413_v40 = vadd.f32 %v411_v38, %v3657_v60  ;;  %v414_v18 = vadd.f32 %v412_v46, %v3658_v49 }
 0x103   : > { %v1604_v28 = vadd.f32 %v1588_v11, %v1564_v12 }
 0x104   : > { %1348 = vmatpush1.msra.mxu0 %v1296_v17  ;;  %vm415_vm5 = vcmp.ge.f32.partialorder %v413_v40, 0.999  ;;  %vm416_vm12 = vcmp.ge.f32.partialorder %v414_v18, 0.999 }
 0x105   : > { %1948 = vmatmul.mubr.msk.f32.vlgmr.msra.gmra.mxu0 %vm933_vm6, %v1947_v3  ;;  %1656 = vmatpush1.msra.mxu1 %v1604_v28  ;;  %v1872_v8 = vsel %vm415_vm5, 1.0, %v3641_v30  ;;  %v1873_v34 = vsel %vm416_vm12, 1.0, %v3641_v30 }
 0x106   : > { %1974 = vmatmul.mubr.msk.f32.vlgmr.msra.gmra.mxu1 %vm933_vm6, %v1973_v10  ;;  %v1701_v54 = vrot.slane %v1872_v8, %v2050_v5  ;;  %v1705_v50 = vrot.slane %v1873_v34, %v2050_v5  ;;  %vm1726_vm6 = vcmask 1042432  }
 0x108   : > { %v1711_v4 = vcombine.low %v1701_v54, %v1705_v50 }
 0x10a   : > { %v1713_v30 = vmul.f32 %v1711_v4, %v1708_v42 }
 0x10c   : > { %v1720_v52 = vcombine.high %v1713_v30, %v1713_v30 }
 0x160   : > { %v1003_v13 = vpop.f32.mrf.mxu0 }
 0x162   : > { %v1005_v0 = vpop.f32.mrf.mxu0 }
 0x163   : > { %v1077_v39 = vpop.f32.mrf.mxu1 }
 0x164   : > { %v1078_v6 = vadd.f32 %v1077_v39, %v1003_v13 }
 0x165   : > { %v1079_v25 = vpop.f32.mrf.mxu1 }
 0x166   : > { %v1080_v22 = vadd.f32 %v1079_v25, %v1005_v0 }
 0x1c5   : > { %v1383_v20 = vpop.f32.mrf.mxu0 }
 0x1c6   : > { %v1388_v19 = vadd.f32 %v1383_v20, %v1078_v6  ;;  %v1691_v61 = vpop.f32.mrf.mxu1 }
 0x1c7   : > { %v1385_v55 = vpop.f32.mrf.mxu0 }
 0x1c8   : > { %v1696_v63 = vadd.f32 %v1691_v61, %v1388_v19  ;;  %v1389_v14 = vadd.f32 %v1385_v55, %v1080_v22  ;;  %v1693_v5 = vpop.f32.mrf.mxu1 }
 0x1ca   : > { %v1706_v21 = vmul.f32 %v1701_v54, %v1696_v63  ;;  %v1697_v44 = vadd.f32 %v1693_v5, %v1389_v14 }
 0x1cc   : > { %v1707_v7 = vmul.f32 %v1705_v50, %v1697_v44  ;;  %v1722_v15 = vsub.f32 %v1706_v21, %v1713_v30 }
 0x1ce   : > { %v1716_v32 = vcombine.low %v1706_v21, %v1707_v7  ;;  %v1723_v33 = vsub.f32 %v1707_v7, %v1720_v52  ;;  %v1724_v48 = vand.u32 2147483647, %v1722_v15 }
 0x1d0   : > { %1718 = vst [vmem:[%s243_s5] sm:$0x77] %v1716_v32  ;;  %v1725_v16 = vand.u32 2147483647, %v1723_v33  ;;  %v1727_v43 = vsel %vm1726_vm6, %v1724_v48, 0.0 }
 0x1d2   : > { %v1728_v51 = vsel %vm1726_vm6, %v1725_v16, 0.0 }
 0x1d3   : > { %v1729_v35 = vadd.f32 %v1728_v51, %v1727_v43 }
 0x1d5   : > { %1730 = vadd.xlane.f32.xlu0 %v1729_v35 }
 0x25e   : > { %v1731_v57 = vpop.xlane.xlu0 %1730 }
 0x25f   : > { %v1732_v9 = vrot.slane %v1731_v57, 4 }
 0x261   : > { %v1733_v45 = vadd.f32 %v1732_v9, %v1731_v57 }
 0x263   : > { %v1734_v37 = vrot.slane %v1733_v45, 2 }
 0x265   : > { %v1735_v27 = vadd.f32 %v1734_v37, %v1733_v45 }
 0x267   : > { %v1736_v1 = vrot.slane %v1735_v27, 1 }
 0x269   : > { %v1737_v56 = vadd.f32 %v1736_v1, %v1735_v27 }
 0x26b   : > { %1989 = vpush %v1737_v56 }
 0x29c   : > { %s1990_s9 = spop %1989 }
 0x29d   : > { %v1739_v24 = vstv %s1990_s9 }
 0x29e   : > { %1741 = vst.msk [vmem:[%s246_s8] sm:$0x1] %vm1740_vm1, %v1739_v24 }
 0x29f PF: > { %s15_s15 = sadd.s32 1, %s2006_s15  }
 0x2a0   : > { %p12_p4 = scmp.ge.s32.totalorder %s15_s15, 4  }
 0x2a2   :  { %14 = sbr.rel (!%p12_p4) target bundleno = 1 (0x1), region = 84 }

</bundles_post_ra>
